<compile_context>
chip_gen: v7x
topology: tpu7x:2x2x1
jax: 0.10.0
libtpu: 0.0.40
codegen_flags: <defaults>
</compile_context>

<pallas_src>
import jax
import jax.numpy as jnp
from jax import lax
from jax.experimental import pallas as pl
from jax.experimental.pallas import tpu as pltpu

# Module hyperparameters (local.__init__ defaults: dim1=3, dim2=3, bias=False)
DIM1 = 3                    # cnn1 in/out channels
DIM2 = 3                    # cnn2 out channels
POOL_H, POOL_W = 25, 250    # AdaptiveMaxPool2d target size
BN_EPS = 1e-5

# VMEM budget for the batch block:
#   one (25,250) f32 plane pads to (32,256) = 32 KiB in VMEM;
#   per batch element, double-buffered in+out = 2*(DIM1+DIM2)*32 KiB = 384 KiB;
#   64 elements -> 24 MiB of pipeline buffers (< 48 MiB scoped limit < v7x's
#   64 MiB physical VMEM).
MAX_BATCH_BLOCK = 64
MIN_GRID_STEPS = 4          # >= 2 feeds both v7x TensorCores; 4 load-balances
VMEM_LIMIT_BYTES = 48 * 1024 * 1024


def _batch_blocking(n: int):
    """Pick (bb, steps): bb <= MAX_BATCH_BLOCK, steps >= MIN_GRID_STEPS (when
    n allows), bb*steps >= n with minimal padding (no bb | n requirement)."""
    steps = min(n, max(MIN_GRID_STEPS, pl.cdiv(n, MAX_BATCH_BLOCK)))
    bb = pl.cdiv(n, steps)
    return bb, steps


def _make_kernel(bb: int):
    """bb = batch elements per grid step (static)."""

    def kernel(w1_ref, b1_ref, w2_ref, b2_ref, x_ref, o_ref):
        # ---- hoist all scalar parameters (SMEM) out of the batch loop ----
        w1 = [[[w1_ref[(co * DIM1 + ci) * 3 + k] for k in range(3)]
               for ci in range(DIM1)] for co in range(DIM1)]
        bias1 = [b1_ref[co] for co in range(DIM1)]
        w2 = [[w2_ref[co * DIM1 + ci] for ci in range(DIM1)] for co in range(DIM2)]
        bias2 = [b2_ref[co] for co in range(DIM2)]

        zcol = jnp.zeros((POOL_H, 1), jnp.float32)   # conv1 zero-halo column

        @pl.loop(0, bb)                              # bounds vreg live ranges
        def _(b):
            # --- cnn1: Conv2d(3,3,k=(1,3),pad=(0,1)) with BN1 folded in ---
            acc = [None] * DIM1
            for ci in range(DIM1):
                c = x_ref[b, ci]                                 # (25,250), sublane 0
                cp = jnp.concatenate([zcol, c, zcol], axis=1)    # (25,252) halo
                xm1 = cp[:, 0:POOL_W]          # in[:, j-1] (zero at j=0)
                xp1 = cp[:, 2:POOL_W + 2]      # in[:, j+1] (zero at j=249)
                for co in range(DIM1):
                    t = (w1[co][ci][0] * xm1
                         + w1[co][ci][1] * c
                         + w1[co][ci][2] * xp1)
                    acc[co] = t if acc[co] is None else acc[co] + t
            h1 = [jnp.maximum(acc[co] + bias1[co], 0.0) for co in range(DIM1)]
            # Dropout2d(0.2): identity at inference.

            # --- cnn2: 1x1 conv with BN2 folded in, + ReLU, streamed out ---
            for co in range(DIM2):
                s = w2[co][0] * h1[0]
                for ci in range(1, DIM1):
                    s = s + w2[co][ci] * h1[ci]
                o_ref[b, co] = jnp.maximum(s + bias2[co], 0.0)

    return kernel


def local_forward(x, w1, bn1, w2, bn2):
    """x: (N, DIM1, Hin, Win) float32, Hin % 25 == 0, Win % 250 == 0.
    w1: (DIM1, DIM1, 1, 3), w2: (DIM2, DIM1, 1, 1).
    bn1/bn2: (gamma, beta, running_mean, running_var), each shape (C,)."""
    N, C, Hin, Win = x.shape
    assert C == DIM1 and Hin % POOL_H == 0 and Win % POOL_W == 0
    kh, kw = Hin // POOL_H, Win // POOL_W

    # ---- AdaptiveMaxPool2d((25,250)), divisible case: one XLA reduction.
    # Reads x from HBM once; writes only the (kh*kw)x smaller pooled array.
    # NOTE: end-to-end this pool (full-size x read) likely dominates wall
    # time; keep it fused with x's producer where possible.
    xp = x.reshape(N, C, POOL_H, kh, POOL_W, kw).max(axis=(3, 5))
    xp = xp.astype(jnp.float32)                       # (N, C, 25, 250)

    # ---- fold inference BatchNorm into conv weights / bias ----
    def fold(bn):
        gamma, beta, mean, var = bn
        s = gamma / jnp.sqrt(var + BN_EPS)
        return s.astype(jnp.float32), (beta - mean * s).astype(jnp.float32)

    s1, b1 = fold(bn1)
    s2, b2 = fold(bn2)
    w1e = (w1.reshape(DIM1, DIM1 * 3).astype(jnp.float32) * s1[:, None]).reshape(-1)
    w2e = (w2.reshape(DIM2, DIM1).astype(jnp.float32) * s2[:, None]).reshape(-1)

    # ---- batch blocking: VMEM-budgeted bb, cdiv grid, pad pooled slab only.
    bb, steps = _batch_blocking(N)
    n_pad = bb * steps
    if n_pad != N:
        xp = jnp.pad(xp, ((0, n_pad - N), (0, 0), (0, 0), (0, 0)))

    smem = pl.BlockSpec(memory_space=pltpu.MemorySpace.SMEM)

    out = pl.pallas_call(
        _make_kernel(bb),
        out_shape=jax.ShapeDtypeStruct((n_pad, DIM2, POOL_H, POOL_W), jnp.float32),
        grid=(steps,),
        in_specs=[
            smem,   # folded conv1 weights (27,)
            smem,   # folded bn1 bias      (3,)
            smem,   # folded conv2 weights (9,)
            smem,   # folded bn2 bias      (3,)
            pl.BlockSpec((bb, DIM1, POOL_H, POOL_W), lambda i: (i, 0, 0, 0)),
        ],
        out_specs=pl.BlockSpec((bb, DIM2, POOL_H, POOL_W), lambda i: (i, 0, 0, 0)),
        compiler_params=pltpu.CompilerParams(
            dimension_semantics=("parallel",),        # shards steps across v7x TCs
            vmem_limit_bytes=VMEM_LIMIT_BYTES,        # blocks <= ~24 MiB + headroom
        ),
    )(w1e, b1, w2e, b2, xp)

    if n_pad != N:
        out = out[:N]
    return out


def ref_forward(x, w1, bn1, w2, bn2):
    """Pure-JAX reference (same math) for validation."""
    N, C, Hin, Win = x.shape
    kh, kw = Hin // POOL_H, Win // POOL_W
    xp = x.reshape(N, C, POOL_H, kh, POOL_W, kw).max(axis=(3, 5))

    def bn_apply(y, bn):
        gamma, beta, mean, var = bn
        s = gamma / jnp.sqrt(var + BN_EPS)
        b = beta - mean * s
        return y * s[None, :, None, None] + b[None, :, None, None]

    y = lax.conv_general_dilated(xp, w1, (1, 1), ((0, 0), (1, 1)),
                                 dimension_numbers=("NCHW", "OIHW", "NCHW"))
    y = jnp.maximum(bn_apply(y, bn1), 0.0)
    y = lax.conv_general_dilated(y, w2, (1, 1), ((0, 0), (0, 0)),
                                 dimension_numbers=("NCHW", "OIHW", "NCHW"))
    y = jnp.maximum(bn_apply(y, bn2), 0.0)
    return y


if __name__ == "__main__":
    key = jax.random.PRNGKey(0)
    ks = jax.random.split(key, 12)

    # Small input consistent with the module: AdaptiveMaxPool2d((25,250)) fixes
    # the pooled size, so use a (2x, 2x)-divisible input.  N=6 exercises batch
    # blocking (bb=2), a multi-step grid (4 steps), and the batch-padding path
    # (6 -> 8 pooled rows, sliced back).
    N = 6
    Hin, Win = 2 * POOL_H, 2 * POOL_W                      # (50, 500)
    x = jax.random.normal(ks[0], (N, DIM1, Hin, Win), jnp.float32)

    # Deterministic synthetic parameters (shapes from local.__init__).
    w1 = 0.3 * jax.random.normal(ks[1], (DIM1, DIM1, 1, 3), jnp.float32)
    w2 = 0.3 * jax.random.normal(ks[2], (DIM2, DIM1, 1, 1), jnp.float32)
    bn1 = (1.0 + 0.1 * jax.random.normal(ks[3], (DIM1,), jnp.float32),   # gamma
           0.1 * jax.random.normal(ks[4], (DIM1,), jnp.float32),         # beta
           0.05 * jax.random.normal(ks[5], (DIM1,), jnp.float32),        # running_mean
           1.0 + 0.1 * jnp.abs(jax.random.normal(ks[6], (DIM1,), jnp.float32)))  # running_var
    bn2 = (1.0 + 0.1 * jax.random.normal(ks[7], (DIM2,), jnp.float32),
           0.1 * jax.random.normal(ks[8], (DIM2,), jnp.float32),
           0.05 * jax.random.normal(ks[9], (DIM2,), jnp.float32),
           1.0 + 0.1 * jnp.abs(jax.random.normal(ks[10], (DIM2,), jnp.float32)))

    fwd = jax.jit(local_forward)
    out = jax.block_until_ready(fwd(x, w1, bn1, w2, bn2))
    assert out.shape == (N, DIM2, POOL_H, POOL_W), out.shape

    ref = jax.block_until_ready(ref_forward(x, w1, bn1, w2, bn2))
    assert jnp.allclose(out, ref, atol=1e-4, rtol=1e-4), float(jnp.max(jnp.abs(out - ref)))

    print("KERNEL_OK")
</pallas_src>

<mosaic_0001>
module attributes {stable_mosaic.version = 11 : i64} {
  func.func @kernel(%arg0: i32, %arg1: memref<27xf32, #tpu.memory_space<smem>>, %arg2: memref<3xf32, #tpu.memory_space<smem>>, %arg3: memref<9xf32, #tpu.memory_space<smem>>, %arg4: memref<3xf32, #tpu.memory_space<smem>>, %arg5: memref<2x3x25x250xf32, #tpu.memory_space<vmem>>, %arg6: memref<2x3x25x250xf32, #tpu.memory_space<vmem>>) attributes {dimension_semantics = [#tpu.dimension_semantics<parallel>], iteration_bounds = array<i64: 4>, scalar_prefetch = 0 : i64, scratch_operands = 0 : i64, tpu.core_type = #tpu.core_type<tc>, window_params = [{transform_indices = @transform_0, window_bounds = array<i64: 27>}, {transform_indices = @transform_1, window_bounds = array<i64: 3>}, {transform_indices = @transform_2, window_bounds = array<i64: 9>}, {transform_indices = @transform_3, window_bounds = array<i64: 3>}, {transform_indices = @transform_4, window_bounds = array<i64: 2, 3, 25, 250>}, {transform_indices = @transform_5, window_bounds = array<i64: 2, 3, 25, 250>}]} {
    %c0 = arith.constant 0 : index
    %0 = memref.load %arg1[%c0] : memref<27xf32, #tpu.memory_space<smem>>
    %c1 = arith.constant 1 : index
    %1 = memref.load %arg1[%c1] : memref<27xf32, #tpu.memory_space<smem>>
    %c2 = arith.constant 2 : index
    %2 = memref.load %arg1[%c2] : memref<27xf32, #tpu.memory_space<smem>>
    %c3 = arith.constant 3 : index
    %3 = memref.load %arg1[%c3] : memref<27xf32, #tpu.memory_space<smem>>
    %c4 = arith.constant 4 : index
    %4 = memref.load %arg1[%c4] : memref<27xf32, #tpu.memory_space<smem>>
    %c5 = arith.constant 5 : index
    %5 = memref.load %arg1[%c5] : memref<27xf32, #tpu.memory_space<smem>>
    %c6 = arith.constant 6 : index
    %6 = memref.load %arg1[%c6] : memref<27xf32, #tpu.memory_space<smem>>
    %c7 = arith.constant 7 : index
    %7 = memref.load %arg1[%c7] : memref<27xf32, #tpu.memory_space<smem>>
    %c8 = arith.constant 8 : index
    %8 = memref.load %arg1[%c8] : memref<27xf32, #tpu.memory_space<smem>>
    %c9 = arith.constant 9 : index
    %9 = memref.load %arg1[%c9] : memref<27xf32, #tpu.memory_space<smem>>
    %c10 = arith.constant 10 : index
    %10 = memref.load %arg1[%c10] : memref<27xf32, #tpu.memory_space<smem>>
    %c11 = arith.constant 11 : index
    %11 = memref.load %arg1[%c11] : memref<27xf32, #tpu.memory_space<smem>>
    %c12 = arith.constant 12 : index
    %12 = memref.load %arg1[%c12] : memref<27xf32, #tpu.memory_space<smem>>
    %c13 = arith.constant 13 : index
    %13 = memref.load %arg1[%c13] : memref<27xf32, #tpu.memory_space<smem>>
    %c14 = arith.constant 14 : index
    %14 = memref.load %arg1[%c14] : memref<27xf32, #tpu.memory_space<smem>>
    %c15 = arith.constant 15 : index
    %15 = memref.load %arg1[%c15] : memref<27xf32, #tpu.memory_space<smem>>
    %c16 = arith.constant 16 : index
    %16 = memref.load %arg1[%c16] : memref<27xf32, #tpu.memory_space<smem>>
    %c17 = arith.constant 17 : index
    %17 = memref.load %arg1[%c17] : memref<27xf32, #tpu.memory_space<smem>>
    %c18 = arith.constant 18 : index
    %18 = memref.load %arg1[%c18] : memref<27xf32, #tpu.memory_space<smem>>
    %c19 = arith.constant 19 : index
    %19 = memref.load %arg1[%c19] : memref<27xf32, #tpu.memory_space<smem>>
    %c20 = arith.constant 20 : index
    %20 = memref.load %arg1[%c20] : memref<27xf32, #tpu.memory_space<smem>>
    %c21 = arith.constant 21 : index
    %21 = memref.load %arg1[%c21] : memref<27xf32, #tpu.memory_space<smem>>
    %c22 = arith.constant 22 : index
    %22 = memref.load %arg1[%c22] : memref<27xf32, #tpu.memory_space<smem>>
    %c23 = arith.constant 23 : index
    %23 = memref.load %arg1[%c23] : memref<27xf32, #tpu.memory_space<smem>>
    %c24 = arith.constant 24 : index
    %24 = memref.load %arg1[%c24] : memref<27xf32, #tpu.memory_space<smem>>
    %c25 = arith.constant 25 : index
    %25 = memref.load %arg1[%c25] : memref<27xf32, #tpu.memory_space<smem>>
    %c26 = arith.constant 26 : index
    %26 = memref.load %arg1[%c26] : memref<27xf32, #tpu.memory_space<smem>>
    %c0_0 = arith.constant 0 : index
    %27 = memref.load %arg2[%c0_0] : memref<3xf32, #tpu.memory_space<smem>>
    %c1_1 = arith.constant 1 : index
    %28 = memref.load %arg2[%c1_1] : memref<3xf32, #tpu.memory_space<smem>>
    %c2_2 = arith.constant 2 : index
    %29 = memref.load %arg2[%c2_2] : memref<3xf32, #tpu.memory_space<smem>>
    %c0_3 = arith.constant 0 : index
    %30 = memref.load %arg3[%c0_3] : memref<9xf32, #tpu.memory_space<smem>>
    %c1_4 = arith.constant 1 : index
    %31 = memref.load %arg3[%c1_4] : memref<9xf32, #tpu.memory_space<smem>>
    %c2_5 = arith.constant 2 : index
    %32 = memref.load %arg3[%c2_5] : memref<9xf32, #tpu.memory_space<smem>>
    %c3_6 = arith.constant 3 : index
    %33 = memref.load %arg3[%c3_6] : memref<9xf32, #tpu.memory_space<smem>>
    %c4_7 = arith.constant 4 : index
    %34 = memref.load %arg3[%c4_7] : memref<9xf32, #tpu.memory_space<smem>>
    %c5_8 = arith.constant 5 : index
    %35 = memref.load %arg3[%c5_8] : memref<9xf32, #tpu.memory_space<smem>>
    %c6_9 = arith.constant 6 : index
    %36 = memref.load %arg3[%c6_9] : memref<9xf32, #tpu.memory_space<smem>>
    %c7_10 = arith.constant 7 : index
    %37 = memref.load %arg3[%c7_10] : memref<9xf32, #tpu.memory_space<smem>>
    %c8_11 = arith.constant 8 : index
    %38 = memref.load %arg3[%c8_11] : memref<9xf32, #tpu.memory_space<smem>>
    %c0_12 = arith.constant 0 : index
    %39 = memref.load %arg4[%c0_12] : memref<3xf32, #tpu.memory_space<smem>>
    %c1_13 = arith.constant 1 : index
    %40 = memref.load %arg4[%c1_13] : memref<3xf32, #tpu.memory_space<smem>>
    %c2_14 = arith.constant 2 : index
    %41 = memref.load %arg4[%c2_14] : memref<3xf32, #tpu.memory_space<smem>>
    %cst = arith.constant 0.000000e+00 : f32
    %42 = vector.broadcast %cst : f32 to vector<25x1xf32>
    %c0_i32 = arith.constant 0 : i32
    %c2_i32 = arith.constant 2 : i32
    %43 = arith.addi %c0_i32, %c2_i32 : i32
    %c1_i32 = arith.constant 1 : i32
    scf.for %arg7 = %c0_i32 to %43 step %c1_i32  : i32 {
      %c1_i32_16 = arith.constant 1 : i32
      %44 = arith.muli %arg7, %c1_i32_16 : i32
      %c0_i32_17 = arith.constant 0 : i32
      %45 = arith.addi %c0_i32_17, %44 : i32
      %46 = arith.index_cast %45 : i32 to index
      %c0_18 = arith.constant 0 : index
      %c0_19 = arith.constant 0 : index
      %c0_20 = arith.constant 0 : index
      %47 = vector.load %arg5[%46, %c0_18, %c0_19, %c0_20] : memref<2x3x25x250xf32, #tpu.memory_space<vmem>>, vector<1x1x25x250xf32>
      %48 = vector.shape_cast %47 : vector<1x1x25x250xf32> to vector<25x250xf32>
      %49 = tpu.concatenate %42, %48, %42 in 1 : vector<25x1xf32>, vector<25x250xf32>, vector<25x1xf32> -> vector<25x252xf32>
      %50 = vector.extract_strided_slice %49 {offsets = [0, 0], sizes = [25, 250], strides = [1, 1]} : vector<25x252xf32> to vector<25x250xf32>
      %51 = vector.extract_strided_slice %49 {offsets = [0, 2], sizes = [25, 250], strides = [1, 1]} : vector<25x252xf32> to vector<25x250xf32>
      %52 = vector.broadcast %0 : f32 to vector<25x250xf32>
      %53 = arith.mulf %52, %50 : vector<25x250xf32>
      %54 = vector.broadcast %1 : f32 to vector<25x250xf32>
      %55 = arith.mulf %54, %48 : vector<25x250xf32>
      %56 = arith.addf %53, %55 : vector<25x250xf32>
      %57 = vector.broadcast %2 : f32 to vector<25x250xf32>
      %58 = arith.mulf %57, %51 : vector<25x250xf32>
      %59 = arith.addf %56, %58 : vector<25x250xf32>
      %60 = vector.broadcast %9 : f32 to vector<25x250xf32>
      %61 = arith.mulf %60, %50 : vector<25x250xf32>
      %62 = vector.broadcast %10 : f32 to vector<25x250xf32>
      %63 = arith.mulf %62, %48 : vector<25x250xf32>
      %64 = arith.addf %61, %63 : vector<25x250xf32>
      %65 = vector.broadcast %11 : f32 to vector<25x250xf32>
      %66 = arith.mulf %65, %51 : vector<25x250xf32>
      %67 = arith.addf %64, %66 : vector<25x250xf32>
      %68 = vector.broadcast %18 : f32 to vector<25x250xf32>
      %69 = arith.mulf %68, %50 : vector<25x250xf32>
      %70 = vector.broadcast %19 : f32 to vector<25x250xf32>
      %71 = arith.mulf %70, %48 : vector<25x250xf32>
      %72 = arith.addf %69, %71 : vector<25x250xf32>
      %73 = vector.broadcast %20 : f32 to vector<25x250xf32>
      %74 = arith.mulf %73, %51 : vector<25x250xf32>
      %75 = arith.addf %72, %74 : vector<25x250xf32>
      %76 = arith.index_cast %45 : i32 to index
      %c1_21 = arith.constant 1 : index
      %c0_22 = arith.constant 0 : index
      %c0_23 = arith.constant 0 : index
      %77 = vector.load %arg5[%76, %c1_21, %c0_22, %c0_23] : memref<2x3x25x250xf32, #tpu.memory_space<vmem>>, vector<1x1x25x250xf32>
      %78 = vector.shape_cast %77 : vector<1x1x25x250xf32> to vector<25x250xf32>
      %79 = tpu.concatenate %42, %78, %42 in 1 : vector<25x1xf32>, vector<25x250xf32>, vector<25x1xf32> -> vector<25x252xf32>
      %80 = vector.extract_strided_slice %79 {offsets = [0, 0], sizes = [25, 250], strides = [1, 1]} : vector<25x252xf32> to vector<25x250xf32>
      %81 = vector.extract_strided_slice %79 {offsets = [0, 2], sizes = [25, 250], strides = [1, 1]} : vector<25x252xf32> to vector<25x250xf32>
      %82 = vector.broadcast %3 : f32 to vector<25x250xf32>
      %83 = arith.mulf %82, %80 : vector<25x250xf32>
      %84 = vector.broadcast %4 : f32 to vector<25x250xf32>
      %85 = arith.mulf %84, %78 : vector<25x250xf32>
      %86 = arith.addf %83, %85 : vector<25x250xf32>
      %87 = vector.broadcast %5 : f32 to vector<25x250xf32>
      %88 = arith.mulf %87, %81 : vector<25x250xf32>
      %89 = arith.addf %86, %88 : vector<25x250xf32>
      %90 = arith.addf %59, %89 : vector<25x250xf32>
      %91 = vector.broadcast %12 : f32 to vector<25x250xf32>
      %92 = arith.mulf %91, %80 : vector<25x250xf32>
      %93 = vector.broadcast %13 : f32 to vector<25x250xf32>
      %94 = arith.mulf %93, %78 : vector<25x250xf32>
      %95 = arith.addf %92, %94 : vector<25x250xf32>
      %96 = vector.broadcast %14 : f32 to vector<25x250xf32>
      %97 = arith.mulf %96, %81 : vector<25x250xf32>
      %98 = arith.addf %95, %97 : vector<25x250xf32>
      %99 = arith.addf %67, %98 : vector<25x250xf32>
      %100 = vector.broadcast %21 : f32 to vector<25x250xf32>
      %101 = arith.mulf %100, %80 : vector<25x250xf32>
      %102 = vector.broadcast %22 : f32 to vector<25x250xf32>
      %103 = arith.mulf %102, %78 : vector<25x250xf32>
      %104 = arith.addf %101, %103 : vector<25x250xf32>
      %105 = vector.broadcast %23 : f32 to vector<25x250xf32>
      %106 = arith.mulf %105, %81 : vector<25x250xf32>
      %107 = arith.addf %104, %106 : vector<25x250xf32>
      %108 = arith.addf %75, %107 : vector<25x250xf32>
      %109 = arith.index_cast %45 : i32 to index
      %c2_24 = arith.constant 2 : index
      %c0_25 = arith.constant 0 : index
      %c0_26 = arith.constant 0 : index
      %110 = vector.load %arg5[%109, %c2_24, %c0_25, %c0_26] : memref<2x3x25x250xf32, #tpu.memory_space<vmem>>, vector<1x1x25x250xf32>
      %111 = vector.shape_cast %110 : vector<1x1x25x250xf32> to vector<25x250xf32>
      %112 = tpu.concatenate %42, %111, %42 in 1 : vector<25x1xf32>, vector<25x250xf32>, vector<25x1xf32> -> vector<25x252xf32>
      %113 = vector.extract_strided_slice %112 {offsets = [0, 0], sizes = [25, 250], strides = [1, 1]} : vector<25x252xf32> to vector<25x250xf32>
      %114 = vector.extract_strided_slice %112 {offsets = [0, 2], sizes = [25, 250], strides = [1, 1]} : vector<25x252xf32> to vector<25x250xf32>
      %115 = vector.broadcast %6 : f32 to vector<25x250xf32>
      %116 = arith.mulf %115, %113 : vector<25x250xf32>
      %117 = vector.broadcast %7 : f32 to vector<25x250xf32>
      %118 = arith.mulf %117, %111 : vector<25x250xf32>
      %119 = arith.addf %116, %118 : vector<25x250xf32>
      %120 = vector.broadcast %8 : f32 to vector<25x250xf32>
      %121 = arith.mulf %120, %114 : vector<25x250xf32>
      %122 = arith.addf %119, %121 : vector<25x250xf32>
      %123 = arith.addf %90, %122 : vector<25x250xf32>
      %124 = vector.broadcast %15 : f32 to vector<25x250xf32>
      %125 = arith.mulf %124, %113 : vector<25x250xf32>
      %126 = vector.broadcast %16 : f32 to vector<25x250xf32>
      %127 = arith.mulf %126, %111 : vector<25x250xf32>
      %128 = arith.addf %125, %127 : vector<25x250xf32>
      %129 = vector.broadcast %17 : f32 to vector<25x250xf32>
      %130 = arith.mulf %129, %114 : vector<25x250xf32>
      %131 = arith.addf %128, %130 : vector<25x250xf32>
      %132 = arith.addf %99, %131 : vector<25x250xf32>
      %133 = vector.broadcast %24 : f32 to vector<25x250xf32>
      %134 = arith.mulf %133, %113 : vector<25x250xf32>
      %135 = vector.broadcast %25 : f32 to vector<25x250xf32>
      %136 = arith.mulf %135, %111 : vector<25x250xf32>
      %137 = arith.addf %134, %136 : vector<25x250xf32>
      %138 = vector.broadcast %26 : f32 to vector<25x250xf32>
      %139 = arith.mulf %138, %114 : vector<25x250xf32>
      %140 = arith.addf %137, %139 : vector<25x250xf32>
      %141 = arith.addf %108, %140 : vector<25x250xf32>
      %142 = vector.broadcast %27 : f32 to vector<25x250xf32>
      %143 = arith.addf %123, %142 : vector<25x250xf32>
      %cst_27 = arith.constant 0.000000e+00 : f32
      %144 = vector.broadcast %cst_27 : f32 to vector<25x250xf32>
      %145 = arith.maximumf %143, %144 : vector<25x250xf32>
      %146 = vector.broadcast %28 : f32 to vector<25x250xf32>
      %147 = arith.addf %132, %146 : vector<25x250xf32>
      %cst_28 = arith.constant 0.000000e+00 : f32
      %148 = vector.broadcast %cst_28 : f32 to vector<25x250xf32>
      %149 = arith.maximumf %147, %148 : vector<25x250xf32>
      %150 = vector.broadcast %29 : f32 to vector<25x250xf32>
      %151 = arith.addf %141, %150 : vector<25x250xf32>
      %cst_29 = arith.constant 0.000000e+00 : f32
      %152 = vector.broadcast %cst_29 : f32 to vector<25x250xf32>
      %153 = arith.maximumf %151, %152 : vector<25x250xf32>
      %154 = vector.broadcast %30 : f32 to vector<25x250xf32>
      %155 = arith.mulf %154, %145 : vector<25x250xf32>
      %156 = vector.broadcast %31 : f32 to vector<25x250xf32>
      %157 = arith.mulf %156, %149 : vector<25x250xf32>
      %158 = arith.addf %155, %157 : vector<25x250xf32>
      %159 = vector.broadcast %32 : f32 to vector<25x250xf32>
      %160 = arith.mulf %159, %153 : vector<25x250xf32>
      %161 = arith.addf %158, %160 : vector<25x250xf32>
      %162 = vector.broadcast %39 : f32 to vector<25x250xf32>
      %163 = arith.addf %161, %162 : vector<25x250xf32>
      %cst_30 = arith.constant 0.000000e+00 : f32
      %164 = vector.broadcast %cst_30 : f32 to vector<25x250xf32>
      %165 = arith.maximumf %163, %164 : vector<25x250xf32>
      %166 = arith.index_cast %45 : i32 to index
      %c0_31 = arith.constant 0 : index
      %c0_32 = arith.constant 0 : index
      %c0_33 = arith.constant 0 : index
      %167 = vector.load %arg6[%166, %c0_31, %c0_32, %c0_33] : memref<2x3x25x250xf32, #tpu.memory_space<vmem>>, vector<1x1x25x250xf32>
      %168 = vector.shape_cast %167 : vector<1x1x25x250xf32> to vector<25x250xf32>
      %169 = vector.shape_cast %165 : vector<25x250xf32> to vector<1x1x25x250xf32>
      tpu.vector_store %arg6[%166, %c0_31, %c0_32, %c0_33], %169 {strides = array<i32>} : memref<2x3x25x250xf32, #tpu.memory_space<vmem>>, vector<1x1x25x250xf32>,
      %170 = vector.broadcast %33 : f32 to vector<25x250xf32>
      %171 = arith.mulf %170, %145 : vector<25x250xf32>
      %172 = vector.broadcast %34 : f32 to vector<25x250xf32>
      %173 = arith.mulf %172, %149 : vector<25x250xf32>
      %174 = arith.addf %171, %173 : vector<25x250xf32>
      %175 = vector.broadcast %35 : f32 to vector<25x250xf32>
      %176 = arith.mulf %175, %153 : vector<25x250xf32>
      %177 = arith.addf %174, %176 : vector<25x250xf32>
      %178 = vector.broadcast %40 : f32 to vector<25x250xf32>
      %179 = arith.addf %177, %178 : vector<25x250xf32>
      %cst_34 = arith.constant 0.000000e+00 : f32
      %180 = vector.broadcast %cst_34 : f32 to vector<25x250xf32>
      %181 = arith.maximumf %179, %180 : vector<25x250xf32>
      %182 = arith.index_cast %45 : i32 to index
      %c1_35 = arith.constant 1 : index
      %c0_36 = arith.constant 0 : index
      %c0_37 = arith.constant 0 : index
      %183 = vector.load %arg6[%182, %c1_35, %c0_36, %c0_37] : memref<2x3x25x250xf32, #tpu.memory_space<vmem>>, vector<1x1x25x250xf32>
      %184 = vector.shape_cast %183 : vector<1x1x25x250xf32> to vector<25x250xf32>
      %185 = vector.shape_cast %181 : vector<25x250xf32> to vector<1x1x25x250xf32>
      tpu.vector_store %arg6[%182, %c1_35, %c0_36, %c0_37], %185 {strides = array<i32>} : memref<2x3x25x250xf32, #tpu.memory_space<vmem>>, vector<1x1x25x250xf32>,
      %186 = vector.broadcast %36 : f32 to vector<25x250xf32>
      %187 = arith.mulf %186, %145 : vector<25x250xf32>
      %188 = vector.broadcast %37 : f32 to vector<25x250xf32>
      %189 = arith.mulf %188, %149 : vector<25x250xf32>
      %190 = arith.addf %187, %189 : vector<25x250xf32>
      %191 = vector.broadcast %38 : f32 to vector<25x250xf32>
      %192 = arith.mulf %191, %153 : vector<25x250xf32>
      %193 = arith.addf %190, %192 : vector<25x250xf32>
      %194 = vector.broadcast %41 : f32 to vector<25x250xf32>
      %195 = arith.addf %193, %194 : vector<25x250xf32>
      %cst_38 = arith.constant 0.000000e+00 : f32
      %196 = vector.broadcast %cst_38 : f32 to vector<25x250xf32>
      %197 = arith.maximumf %195, %196 : vector<25x250xf32>
      %198 = arith.index_cast %45 : i32 to index
      %c2_39 = arith.constant 2 : index
      %c0_40 = arith.constant 0 : index
      %c0_41 = arith.constant 0 : index
      %199 = vector.load %arg6[%198, %c2_39, %c0_40, %c0_41] : memref<2x3x25x250xf32, #tpu.memory_space<vmem>>, vector<1x1x25x250xf32>
      %200 = vector.shape_cast %199 : vector<1x1x25x250xf32> to vector<25x250xf32>
      %201 = vector.shape_cast %197 : vector<25x250xf32> to vector<1x1x25x250xf32>
      tpu.vector_store %arg6[%198, %c2_39, %c0_40, %c0_41], %201 {strides = array<i32>} : memref<2x3x25x250xf32, #tpu.memory_space<vmem>>, vector<1x1x25x250xf32>,
    }
    %c2_i32_15 = arith.constant 2 : i32
    return
  }
  func.func @transform_0(%arg0: i32) -> i32 {
    %c0_i32 = arith.constant 0 : i32
    %c0_i32_0 = arith.constant 0 : i32
    return %c0_i32 : i32
  }
  func.func @transform_1(%arg0: i32) -> i32 {
    %c0_i32 = arith.constant 0 : i32
    %c0_i32_0 = arith.constant 0 : i32
    return %c0_i32 : i32
  }
  func.func @transform_2(%arg0: i32) -> i32 {
    %c0_i32 = arith.constant 0 : i32
    %c0_i32_0 = arith.constant 0 : i32
    return %c0_i32 : i32
  }
  func.func @transform_3(%arg0: i32) -> i32 {
    %c0_i32 = arith.constant 0 : i32
    %c0_i32_0 = arith.constant 0 : i32
    return %c0_i32 : i32
  }
  func.func @transform_4(%arg0: i32) -> (i32, i32, i32, i32) {
    %c0_i32 = arith.constant 0 : i32
    %c0_i32_0 = arith.constant 0 : i32
    %c0_i32_1 = arith.constant 0 : i32
    %c0_i32_2 = arith.constant 0 : i32
    return %arg0, %c0_i32, %c0_i32_0, %c0_i32_1 : i32, i32, i32, i32
  }
  func.func @transform_5(%arg0: i32) -> (i32, i32, i32, i32) {
    %c0_i32 = arith.constant 0 : i32
    %c0_i32_0 = arith.constant 0 : i32
    %c0_i32_1 = arith.constant 0 : i32
    %c0_i32_2 = arith.constant 0 : i32
    return %arg0, %c0_i32, %c0_i32_0, %c0_i32_1 : i32, i32, i32, i32
  }
}

</mosaic_0001>

<bundles_post_ra>
// kernel: mul.1
= control target key start
LH: loop header
LB: loop body
LE: loop exit
PB: predicated region body
PF: predicated region fallthrough
CT: control target
= control target key end

     0   :  { %s34_s0 = inlined_call_operand.vmem [shape: f32[9], index: 0, kind: input, shape index: {}]   ;;  %s35_s1 = inlined_call_operand.vmem [shape: f32[9], index: 1, kind: input, shape index: {}]   ;;  %s36_s2 = inlined_call_operand.vmem [shape: f32[9], index: 2, kind: output, shape index: {}]  }
   0x1   :  { %v3_v0 = vld [vmem:[%s34_s0] sm:$0x1] }
   0x2   :  { %v4_v1 = vld [vmem:[%s35_s1] sm:$0x1] }
   0x3   :  { %v7_v2 = vmul.f32 %v4_v1, %v3_v0 }
   0x5   :  { %9 = vst [vmem:[%s36_s2] sm:$0x1] %v7_v2 }

// kernel: mul.0
= control target key start
LH: loop header
LB: loop body
LE: loop exit
PB: predicated region body
PF: predicated region fallthrough
CT: control target
= control target key end

     0   :  { %s34_s0 = inlined_call_operand.vmem [shape: f32[27], index: 0, kind: input, shape index: {}]   ;;  %s35_s1 = inlined_call_operand.vmem [shape: f32[27], index: 1, kind: input, shape index: {}]   ;;  %s36_s2 = inlined_call_operand.vmem [shape: f32[27], index: 2, kind: output, shape index: {}]  }
   0x1   :  { %v3_v0 = vld [vmem:[%s34_s0] sm:$0x1] }
   0x2   :  { %v4_v1 = vld [vmem:[%s35_s1] sm:$0x1] }
   0x3   :  { %v7_v2 = vmul.f32 %v4_v1, %v3_v0 }
   0x5   :  { %9 = vst [vmem:[%s36_s2] sm:$0x1] %v7_v2 }

// kernel: local_forward.1
= control target key start
LH: loop header
LB: loop body
LE: loop exit
PB: predicated region body
PF: predicated region fallthrough
CT: control target
= control target key end

     0   :  { %s3662_s0 = inlined_call_operand.vmem [shape: f32[27], index: 0, kind: input, shape index: {}]   ;;  %s3663_s1 = inlined_call_operand.vmem [shape: f32[3], index: 1, kind: input, shape index: {}]   ;;  %s3664_s2 = inlined_call_operand.vmem [shape: f32[9], index: 2, kind: input, shape index: {}]   ;;  %s3665_s3 = inlined_call_operand.vmem [shape: f32[3], index: 3, kind: input, shape index: {}]   ;;  %s3666_s4 = inlined_call_operand.vmem [shape: f32[8,3,25,250], index: 4, kind: input, shape index: {}]   ;;  %s3667_s5 = inlined_call_operand.vmem [shape: f32[8,3,25,250], index: 5, kind: output, shape index: {}]  }
   0x1   :  { %3677 = sst [smem:[#allocation58_spill]] %s3662_s0 }
   0x2   :  { %3678 = sst [smem:[#allocation59_spill]] %s3663_s1 }
   0x3   :  { %3679 = sst [smem:[#allocation60_spill]] %s3664_s2 }
   0x4   :  { %3680 = sst [smem:[#allocation61_spill]] %s3665_s3 }
   0x5   :  { %3681 = sst [smem:[#allocation62_spill]] %s3666_s4 }
   0x6   :  { %3682 = sst [smem:[#allocation63_spill]] %s3667_s5 }
   0x7   :  { %10 = vsyncpa [#allocation3], 0 }
   0x8   :  { %11 = vsyncpa [#allocation5], 0 }
   0x9   :  { %12 = vsyncpa [#allocation8], 0  ;;  %s1935_s18 = smov 0  }
   0xa LB: > { %3683 = sst [smem:[#allocation12_spill]] %s1893_s18  ;;  %s3684_s1 = sld [smem:[#allocation59_spill]]  ;;  %s1893_s18 = sphi %s1935_s18, %s18_s18  }
   0xb   : > { %s1647_s22 = sadd.s32 4294967295, %s1893_s18   ;;  %p1649_p0 = scmp.ge.s32.totalorder %s1893_s18, 1 }
   0xc   : > { %p159_p1 = scmp.lt.s32.totalorder %s1893_s18, 5  ;;  %p1948_p2 = scmp.eq.s32.totalorder %s1647_s22, 0 }
   0xd   : > { %s3687_s0 = sld [smem:[#allocation58_spill]]  ;;  %s3688_s2 = sld [smem:[#allocation60_spill]] }
   0xe   : > { %p1952_p3 = pnand %p1649_p0, %p159_p1  ;;  %s3690_s3 = sld [smem:[#allocation61_spill]] }
  0x10   : > { %s183_s21 = sshll.u32 %s3684_s1, 4  ;;  %p1761_p4 = pneg %p1952_p3  ;;  %s184_s21 = int_to_ptr.vmem [resolvable:$true] %s183_s21 }
  0x11   : > { %s1811_s10 = scalar_lea.vmem %s184_s21, 16  ;;  %p1819_p10 = scmp.lt.s32.totalorder %s184_s21, %s184_s21 }
  0x12   : > { %p1970_p5 = pnand %p1948_p2, %p1761_p4  ;;  %p1812_p6 = scmp.ne.s32.totalorder %s184_s21, %s1811_s10 }
  0x13   : > { %s172_s27 = sshll.u32 %s3687_s0, 4  ;;  %s194_s30 = sshll.u32 %s3688_s2, 4  ;;  %s1959_s27 = int_to_ptr.vmem [resolvable:$true] %s172_s27  ;;  %s1966_s30 = int_to_ptr.vmem [resolvable:$true] %s194_s30 }
  0x14   : > { %s205_s9 = sshll.u32 %s3690_s3, 4  ;;  %p1813_p7 = pneg %p1970_p5  ;;  %s1977_s9 = int_to_ptr.vmem [resolvable:$true] %s205_s9 }
  0x15   : > { %p1820_p11 = scmp.lt.s32.totalorder %s1811_s10, %s1811_s10 }
  0x16   : > { %p1814_p8 = pnand %p1813_p7, %p1812_p6 }
  0x17   : > { %p1821_p12 = por %p1820_p11, %p1819_p10 }
  0x18   : > { %p1815_p9 = pneg %p1814_p8 }
  0x1a   : > { %p1822_p13 = pnand %p1821_p12, %p1815_p9 }
  0x1c   : > { %1825 = shalt.err (!%p1822_p13)
}
  0x1d   : > { %s1899_s11 = smov [#allocation4]   ;;  %s1826_s12 = scalar_lea.vmem %s1959_s27, 16 }
  0x1e   : > { %1767 = dma.vmem_to_smem (!%p1970_p5), %s184_s21, 16, %s1899_s11, [#allocation5]  }
  0x1f   : > { %p1827_p0 = scmp.ne.s32.totalorder %s1959_s27, %s1826_s12  ;;  %p1834_p6 = scmp.lt.s32.totalorder %s1959_s27, %s1959_s27 }
  0x20   : > { %p1835_p8 = scmp.lt.s32.totalorder %s1826_s12, %s1826_s12 }
  0x21   : > { %p1829_p1 = pnand %p1827_p0, %p1813_p7 }
  0x22   : > { %p1836_p10 = por %p1835_p8, %p1834_p6 }
  0x23   : > { %p1830_p4 = pneg %p1829_p1 }
  0x25   : > { %p1837_p9 = pnand %p1836_p10, %p1830_p4 }
  0x27   : > { %1840 = shalt.err (!%p1837_p9)
}
  0x28   : > { %s1900_s13 = smov [#allocation2]   ;;  %s1841_s14 = scalar_lea.vmem %s1966_s30, 16 }
  0x29   : > { %1764 = dma.vmem_to_smem (!%p1970_p5), %s1959_s27, 16, %s1900_s13, [#allocation3]  }
  0x2a   : > { %p1842_p11 = scmp.ne.s32.totalorder %s1966_s30, %s1841_s14  ;;  %p1849_p0 = scmp.lt.s32.totalorder %s1966_s30, %s1966_s30 }
  0x2b   : > { %p1850_p1 = scmp.lt.s32.totalorder %s1841_s14, %s1841_s14 }
  0x2c   : > { %p1844_p12 = pnand %p1842_p11, %p1813_p7 }
  0x2d   : > { %p1851_p4 = por %p1850_p1, %p1849_p0 }
  0x2e   : > { %p1845_p13 = pneg %p1844_p12 }
  0x30   : > { %p1852_p6 = pnand %p1851_p4, %p1845_p13 }
  0x32   : > { %1855 = shalt.err (!%p1852_p6)
}
  0x33   : > { %s1901_s15 = smov [#allocation6]   ;;  %s1856_s16 = scalar_lea.vmem %s1977_s9, 16 }
  0x34   : > { %1770 = dma.vmem_to_smem (!%p1970_p5), %s1966_s30, 16, %s1901_s15, [#allocation5]  }
  0x35   : > { %p1857_p8 = scmp.ne.s32.totalorder %s1977_s9, %s1856_s16  ;;  %p1864_p11 = scmp.lt.s32.totalorder %s1977_s9, %s1977_s9 }
  0x36   : > { %p1865_p12 = scmp.lt.s32.totalorder %s1856_s16, %s1856_s16 }
  0x37   : > { %p1859_p10 = pnand %p1857_p8, %p1813_p7 }
  0x38   : > { %p1866_p13 = por %p1865_p12, %p1864_p11 }
  0x39   : > { %p1860_p9 = pneg %p1859_p10 }
  0x3b   : > { %p1867_p0 = pnand %p1866_p13, %p1860_p9 }
  0x3d   : > { %1870 = shalt.err (!%p1867_p0)
}
  0x3e   : > { %s1902_s17 = smov [#allocation7]   ;;  %228 = sbr.rel (%p1952_p3) target bundleno = 541 (0x21d), region = 40 }
  0x3f   : > { %1773 = dma.vmem_to_smem (!%p1970_p5), %s1977_s9, 16, %s1902_s17, [#allocation8]  }
  0x45   : > { %1880 = dma.done.wait (%p1948_p2), [#allocation3], 16  }
  0x46   : > { %1882 = vsyncadd (%p1948_p2), [#allocation3], 4294967280 }
  0x47   : > { %1884 = dma.done.wait (%p1948_p2), [#allocation5], 32  }
  0x48   : > { %1886 = vsyncadd (%p1948_p2), [#allocation5], 4294967264 }
  0x49   : > { %1888 = dma.done.wait (%p1948_p2), [#allocation8], 16  }
  0x4a   : > { %1890 = vsyncadd (%p1948_p2), [#allocation8], 4294967280 }
  0x4b   : > { %246 = sfence }
  0x4c   : > { %s1660_s19 = sshll.u32 %s1647_s22, 1  ;;  %s2032_s20 = sld [smem:[#allocation2]] }
  0x4d   : > { %p272_p3 = scmp.lt.s32.totalorder %s1660_s19, 7  ;;  %s2034_s21 = sld [smem:[#allocation2 + $0x1]] }
  0x4e   : > { %s2036_s24 = sld [smem:[#allocation2 + $0x2]]  ;;  %s2038_s25 = sld [smem:[#allocation2 + $0x3]] }
  0x4f   : > { %s3842_s19 = smov (!%p272_p3, %s1660_s19), 7  ;;  %s2040_s26 = sld [smem:[#allocation2 + $0x4]] }
  0x50   : > { %s2042_s27 = sld [smem:[#allocation2 + $0x5]]  ;;  %s1744_s23 = smul.u32 192, %s3842_s19 }
  0x51   : > { %s2044_s28 = sld [smem:[#allocation2 + $0x6]]  ;;  %s2046_s29 = sld [smem:[#allocation2 + $0x7]] }
  0x52   : > { %s2048_s22 = sld [smem:[#allocation2 + $0x8]]  ;;  %s3693_s4 = sld [smem:[#allocation62_spill]] }
  0x53   : > { %s3695_s5 = sld [smem:[#allocation63_spill]]  ;;  %s2060_s11 = sld [smem:[#allocation2 + $0x9]] }
  0x54   : > { %s2062_s12 = sld [smem:[#allocation2 + $0xa]]  ;;  %s2064_s13 = sld [smem:[#allocation2 + $0xb]] }
  0x55   : > { %s2066_s14 = sld [smem:[#allocation2 + $0xc]]  ;;  %s2068_s15 = sld [smem:[#allocation2 + $0xd]] }
  0x56   : > { %s2070_s16 = sld [smem:[#allocation2 + $0xe]]  ;;  %s2072_s17 = sld [smem:[#allocation2 + $0xf]] }
  0x57   : > { %3691 = sst [smem:[#allocation13_spill]] %s2044_s28  ;;  %s2074_s19 = sld [smem:[#allocation2 + $0x10]] }
  0x58   : > { %3692 = sst [smem:[#allocation14_spill]] %s2046_s29  ;;  %s2053_s7 = scalar_lea.vmem %s3693_s4, %s1744_s23 }
  0x59   : > { %3694 = sst [smem:[#allocation15_spill]] %s2053_s7  ;;  %s2058_s10 = scalar_lea.vmem %s3695_s5, %s1744_s23 }
  0x5a   : > { %3696 = sst [smem:[#allocation16_spill]] %s2058_s10  ;;  %s2076_s30 = sld [smem:[#allocation2 + $0x11]] }
  0x5b   : > { %s2078_s23 = sld [smem:[#allocation2 + $0x12]]  ;;  %s2080_s6 = sld [smem:[#allocation2 + $0x13]] }
  0x5c   : > { %3697 = sst [smem:[#allocation17_spill]] %s2072_s17  ;;  %s2082_s8 = sld [smem:[#allocation2 + $0x14]] }
  0x5d   : > { %3698 = sst [smem:[#allocation18_spill]] %s2074_s19  ;;  %s2084_s9 = sld [smem:[#allocation2 + $0x15]] }
  0x5e   : > { %s2086_s0 = sld [smem:[#allocation2 + $0x16]]  ;;  %s2088_s1 = sld [smem:[#allocation2 + $0x17]] }
  0x5f   : > { %s2090_s2 = sld [smem:[#allocation2 + $0x18]]  ;;  %s2092_s3 = sld [smem:[#allocation2 + $0x19]] }
  0x60   : > { %3699 = sst [smem:[#allocation19_spill]] %s2076_s30  ;;  %s2094_s4 = sld [smem:[#allocation2 + $0x1a]] }
  0x61   : > { %3700 = sst [smem:[#allocation20_spill]] %s2080_s6  ;;  %s2098_s18 = sld [smem:[#allocation4 + $0x1]] }
  0x62   : > { %s2096_s5 = sld [smem:[#allocation4]]  ;;  %s2100_s10 = sld [smem:[#allocation4 + $0x2]] }
  0x63   : > { %s2102_s17 = sld [smem:[#allocation6]]  ;;  %s2104_s28 = sld [smem:[#allocation6 + $0x1]] }
  0x64   : > { %3701 = sst [smem:[#allocation21_spill]] %s2086_s0  ;;  %s2106_s19 = sld [smem:[#allocation6 + $0x2]] }
  0x65   : > { %3702 = sst [smem:[#allocation22_spill]] %s2088_s1  ;;  %s2108_s29 = sld [smem:[#allocation6 + $0x3]] }
  0x66   : > { %3703 = sst [smem:[#allocation23_spill]] %s2090_s2  ;;  %s2110_s30 = sld [smem:[#allocation6 + $0x4]] }
  0x67   : > { %3704 = sst [smem:[#allocation24_spill]] %s2092_s3  ;;  %s2112_s2 = sld [smem:[#allocation6 + $0x5]] }
  0x68   : > { %3705 = sst [smem:[#allocation25_spill]] %s2094_s4  ;;  %s2114_s3 = sld [smem:[#allocation6 + $0x6]] }
  0x69   : > { %3706 = sst [smem:[#allocation26_spill]] %s2096_s5  ;;  %s2116_s4 = sld [smem:[#allocation6 + $0x7]] }
  0x6a   : > { %3707 = sst [smem:[#allocation27_spill]] %s2098_s18  ;;  %s2118_s5 = sld [smem:[#allocation6 + $0x8]] }
  0x6b   : > { %3708 = sst [smem:[#allocation28_spill]] %s2100_s10  ;;  %s2122_s10 = sld [smem:[#allocation7 + $0x1]] }
  0x6c   : > { %3709 = sst [smem:[#allocation29_spill]] %s2102_s17  ;;  %s2120_s18 = sld [smem:[#allocation7]] }
  0x6d   : > { %3710 = sst [smem:[#allocation30_spill]] %s2104_s28  ;;  %s2126_s28 = smov 0  }
  0x6e   : > { %3711 = sst [smem:[#allocation31_spill]] %s2106_s19  ;;  %s2124_s17 = sld [smem:[#allocation7 + $0x2]] }
  0x6f   : > { %3712 = sst [smem:[#allocation32_spill]] %s2112_s2 }
  0x74   : > { %3713 = sst [smem:[#allocation33_spill]] %s2124_s17 }
  0x75 LB: >> { %s3714_s7 = sld [smem:[#allocation15_spill]]  ;;  %s3674_s2 = smul.u32 192, %s1897_s28  ;;  %v399_v24 = vstv %s2034_s21  ;;  %vm368_vm0 = vcmask 7168   ;;  %vm385_vm1 = vcmask 1006592   ;;  %v2244_v25 = vstv %s2036_s24  ;;  %s1897_s28 = sphi %s2126_s28, %s332_s28  }
  0x76   : >> { %s1903_s17 = smov 1   ;;  %s3718_s6 = sld [smem:[#allocation20_spill]]  ;;  %v2247_v26 = vstv %s2064_s13  ;;  %v2250_v27 = vstv %s2082_s8  ;;  %v2253_v28 = vstv %s2032_s20  ;;  %v2256_v29 = vstv %s2060_s11 }
  0x77   : >> { %v479_v30 = vstv %s2062_s12  ;;  %v2263_v36 = vstv %s2078_s23  ;;  %s3725_s0 = sld [smem:[#allocation21_spill]]  ;;  %s3741_s1 = sld [smem:[#allocation22_spill]]  ;;  %vm449_vm2 = vcmask 1031168   ;;  %vm1374_vm3 = vcmask 998400  }
  0x78   : >> { %vm1381_vm4 = vcmask 991232  }
  0x7b   : >> { %s2135_s19 = scalar_lea.vmem %s3714_s7, %s3674_s2  ;;  %s3742_s2 = sld [smem:[#allocation19_spill]] }
  0x7c   : >> { %v2138_v0 = vld [vmem:[%s2135_s19 + $0x10] sm:$0xff]  ;;  %v2141_v1 = vld [vmem:[%s2135_s19] sm:$0xff]  ;;  %v2148_v2 = vld [vmem:[%s2135_s19 + $0x18] sm:$0xff]  ;;  %v2273_v40 = vstv %s3718_s6  ;;  %s3776_s6 = sld [smem:[#allocation17_spill]]  ;;  %s3778_s7 = sld [smem:[#allocation23_spill]] }
  0x7d   : >> { %356 = vrot.lane.b32.xlu1 %v2138_v0, %s1903_s17  ;;  %352 = vrot.lane.b32.xlu0 %v2141_v1, %s1903_s17  ;;  %v2151_v3 = vld [vmem:[%s2135_s19 + $0x8] sm:$0xff]  ;;  %v2158_v4 = vld [vmem:[%s2135_s19 + $0x20] sm:$0xff]  ;;  %v400_v33 = vmul.f32 %v399_v24, %v2141_v1  ;;  %v402_v34 = vmul.f32 %v399_v24, %v2138_v0  ;;  %v403_v35 = vmul.f32 %v399_v24, %v2148_v2 }
  0x7e   : >> { %v2161_v5 = vld [vmem:[%s2135_s19 + $0x28] sm:$0xff]  ;;  %v2168_v6 = vld [vmem:[%s2135_s19 + $0x30] sm:$0x1]  ;;  %v2171_v7 = vld [vmem:[%s2135_s19 + $0x38] sm:$0x1]  ;;  %v401_v39 = vmul.f32 %v399_v24, %v2151_v3  ;;  %v481_v42 = vmul.f32 %v479_v30, %v2151_v3  ;;  %v480_v43 = vmul.f32 %v479_v30, %v2141_v1  ;;  %v482_v44 = vmul.f32 %v479_v30, %v2138_v0 }
  0x7f   : >> { %v2178_v8 = vld [vmem:[%s2135_s19 + $0x40] sm:$0xff]  ;;  %v2181_v9 = vld [vmem:[%s2135_s19 + $0x48] sm:$0xff]  ;;  %v2188_v10 = vld [vmem:[%s2135_s19 + $0x50] sm:$0xff]  ;;  %v404_v47 = vmul.f32 %v399_v24, %v2158_v4  ;;  %v483_v48 = vmul.f32 %v479_v30, %v2148_v2  ;;  %v2295_v54 = vmul.f32 %v2273_v40, %v2141_v1  ;;  %v405_v1 = vmul.f32 %v399_v24, %v2161_v5 }
  0x80   : >> { %v2191_v11 = vld [vmem:[%s2135_s19 + $0x58] sm:$0xff]  ;;  %v2198_v12 = vld [vmem:[%s2135_s19 + $0x60] sm:$0xff]  ;;  %v2201_v13 = vld [vmem:[%s2135_s19 + $0x68] sm:$0xff] }
  0x81   : >> { %358 = vrot.lane.b32.xlu1 %v2148_v2, %s1903_s17  ;;  %354 = vrot.lane.b32.xlu0 %v2151_v3, %s1903_s17  ;;  %v2208_v14 = vld [vmem:[%s2135_s19 + $0x70] sm:$0x1]  ;;  %v2211_v15 = vld [vmem:[%s2135_s19 + $0x78] sm:$0x1] }
  0x82   : >> { %v2218_v16 = vld [vmem:[%s2135_s19 + $0x80] sm:$0xff]  ;;  %v2221_v17 = vld [vmem:[%s2135_s19 + $0x88] sm:$0xff]  ;;  %v2228_v18 = vld [vmem:[%s2135_s19 + $0x90] sm:$0xff] }
  0x83   : >> { %3715 = vst [vmem:[#allocation34_spill] sm:$0xff] %v2218_v16  ;;  %3716 = vst [vmem:[#allocation35_spill] sm:$0xff] %v2221_v17  ;;  %v1716_v19 = vld [vmem:[%s2135_s19 + $0x98] sm:$0xff]  ;;  %v1717_v20 = vld [vmem:[%s2135_s19 + $0xa0] sm:$0xff] }
  0x84   : >> { %3717 = vst [vmem:[#allocation36_spill] sm:$0xff] %v2228_v18  ;;  %v1718_v21 = vld [vmem:[%s2135_s19 + $0xa8] sm:$0xff]  ;;  %v1719_v22 = vld [vmem:[%s2135_s19 + $0xb0] sm:$0x1]  ;;  %v1720_v23 = vld [vmem:[%s2135_s19 + $0xb8] sm:$0x1] }
  0x85   : >> { %360 = vrot.lane.b32.xlu0 %v2158_v4, %s1903_s17  ;;  %362 = vrot.lane.b32.xlu1 %v2161_v5, %s1903_s17 }
  0x89   : >> { %364 = vrot.lane.b32.xlu0 %v2168_v6, %s1903_s17  ;;  %366 = vrot.lane.b32.xlu1 %v2171_v7, %s1903_s17 }
  0x8d   : >> { %647 = vrot.lane.b32.xlu0 %v2178_v8, %s1903_s17  ;;  %649 = vrot.lane.b32.xlu1 %v2181_v9, %s1903_s17 }
  0x91   : >> { %651 = vrot.lane.b32.xlu0 %v2188_v10, %s1903_s17  ;;  %653 = vrot.lane.b32.xlu1 %v2191_v11, %s1903_s17 }
  0x95   : >> { %655 = vrot.lane.b32.xlu0 %v2198_v12, %s1903_s17  ;;  %657 = vrot.lane.b32.xlu1 %v2201_v13, %s1903_s17 }
  0x99   : >> { %659 = vrot.lane.b32.xlu0 %v2208_v14, %s1903_s17  ;;  %661 = vrot.lane.b32.xlu1 %v2211_v15, %s1903_s17 }
  0x9d   : >> { %963 = vrot.lane.b32.xlu0 %v2218_v16, %s1903_s17  ;;  %965 = vrot.lane.b32.xlu1 %v2221_v17, %s1903_s17 }
  0xa1   : >> { %967 = vrot.lane.b32.xlu0 %v2228_v18, %s1903_s17  ;;  %969 = vrot.lane.b32.xlu1 %v1716_v19, %s1903_s17  ;;  %v484_v19 = vmul.f32 %v479_v30, %v2158_v4 }
  0xa5   : >> { %971 = vrot.lane.b32.xlu0 %v1717_v20, %s1903_s17  ;;  %973 = vrot.lane.b32.xlu1 %v1718_v21, %s1903_s17  ;;  %v2318_v20 = vmul.f32 %v479_v30, %v2161_v5 }
  0xa9   : >> { %975 = vrot.lane.b32.xlu0 %v1719_v22, %s1903_s17  ;;  %977 = vrot.lane.b32.xlu1 %v1720_v23, %s1903_s17  ;;  %s1904_s17 = smov 126  }
  0xef   : >> { %v357_v31 = vpop.permute.xlu1 %356  ;;  %v353_v32 = vpop.permute.xlu0 %352 }
  0xf0   : >> { %v2266_v37 = vsel %vm368_vm0, 0.0, %v357_v31  ;;  %v2269_v38 = vsel %vm368_vm0, 0.0, %v353_v32 }
  0xf1   : >> { %v417_v41 = vmul.f32 %v2244_v25, %v2269_v38  ;;  %v391_v45 = vmul.f32 %v2253_v28, %v2269_v38  ;;  %v393_v46 = vmul.f32 %v2253_v28, %v2266_v37  ;;  %v419_v51 = vmul.f32 %v2244_v25, %v2266_v37 }
  0xf2   : >> { %v471_v52 = vmul.f32 %v2256_v29, %v2269_v38  ;;  %v473_v53 = vmul.f32 %v2256_v29, %v2266_v37 }
  0xf3   : >> { %v359_v49 = vpop.permute.xlu1 %358  ;;  %433 = vrot.lane.b32.xlu0 %v417_v41, %s1904_s17  ;;  %v355_v50 = vpop.permute.xlu0 %354  ;;  %v2299_v57 = vadd.f32 %v400_v33, %v391_v45  ;;  %v2301_v58 = vadd.f32 %v402_v34, %v393_v46  ;;  %v2328_v33 = vmul.f32 %v2273_v40, %v2151_v3  ;;  %v407_v46 = vmul.f32 %v399_v24, %v2171_v7 }
  0xf4   : >> { %v370_v55 = vsel %vm368_vm0, %v357_v31, %v359_v49  ;;  %v369_v56 = vsel %vm368_vm0, %v353_v32, %v355_v50  ;;  %v2309_v61 = vadd.f32 %v480_v43, %v471_v52  ;;  %v2311_v62 = vadd.f32 %v482_v44, %v473_v53 }
  0xf5   : >> { %v2304_v59 = vsel %vm385_vm1, %v370_v55, 0.0  ;;  %v2307_v60 = vsel %vm385_vm1, %v369_v56, 0.0  ;;  %v406_v32 = vmul.f32 %v399_v24, %v2168_v6  ;;  %v486_v49 = vmul.f32 %v479_v30, %v2168_v6 }
  0xf6   : >> { %3719 = vst [vmem:[#allocation37_spill] sm:$0xff] %v2309_v61  ;;  %3720 = vst [vmem:[#allocation38_spill] sm:$0xff] %v2311_v62  ;;  %v418_v63 = vmul.f32 %v2244_v25, %v2307_v60  ;;  %v392_v23 = vmul.f32 %v2253_v28, %v2307_v60  ;;  %v394_v31 = vmul.f32 %v2253_v28, %v2304_v59 }
  0xf7   : >> { %437 = vrot.lane.b32.xlu0 %v419_v51, %s1904_s17  ;;  %v361_v21 = vpop.permute.xlu0 %360  ;;  %v363_v22 = vpop.permute.xlu1 %362  ;;  %v472_v43 = vmul.f32 %v2256_v29, %v2307_v60  ;;  %v474_v44 = vmul.f32 %v2256_v29, %v2304_v59  ;;  %v420_v50 = vmul.f32 %v2244_v25, %v2304_v59  ;;  %v487_v53 = vmul.f32 %v479_v30, %v2171_v7 }
  0xf8   : >> { %v2331_v34 = vsel %vm368_vm0, 0.0, %v361_v21  ;;  %435 = vrot.lane.b32.xlu1 %v418_v63, %s1904_s17  ;;  %v371_v41 = vsel %vm368_vm0, %v361_v21, %v363_v22  ;;  %v2350_v52 = vadd.f32 %v401_v39, %v392_v23  ;;  %v2354_v63 = vadd.f32 %v403_v35, %v394_v31 }
  0xf9   : >> { %v2340_v45 = vsel %vm385_vm1, %v371_v41, 0.0  ;;  %v421_v3 = vmul.f32 %v2244_v25, %v2331_v34  ;;  %v395_v24 = vmul.f32 %v2253_v28, %v2331_v34  ;;  %v2360_v22 = vadd.f32 %v481_v42, %v472_v43 }
  0xfa   : >> { %v422_v51 = vmul.f32 %v2244_v25, %v2340_v45  ;;  %v396_v21 = vmul.f32 %v2253_v28, %v2340_v45  ;;  %v2367_v39 = vadd.f32 %v483_v48, %v474_v44  ;;  %v475_v35 = vmul.f32 %v2256_v29, %v2331_v34 }
  0xfb   : >> { %441 = vrot.lane.b32.xlu0 %v421_v3, %s1904_s17  ;;  %v365_v55 = vpop.permute.xlu0 %364  ;;  %v367_v56 = vpop.permute.xlu1 %366  ;;  %3721 = vst [vmem:[#allocation39_spill] sm:$0xff] %v2360_v22  ;;  %v561_v42 = vmul.f32 %v2273_v40, %v2138_v0  ;;  %v2380_v43 = vmul.f32 %v2273_v40, %v2148_v2  ;;  %v2382_v3 = vadd.f32 %v404_v47, %v395_v24 }
  0xfc   : >> { %v2363_v41 = vsel %vm368_vm0, 0.0, %v365_v55  ;;  %439 = vrot.lane.b32.xlu1 %v420_v50, %s1904_s17  ;;  %v372_v30 = vsel %vm368_vm0, %v365_v55, %v367_v56  ;;  %3722 = vst [vmem:[#allocation40_spill] sm:$0xff] %v2367_v39  ;;  %v2386_v48 = vmul.f32 %v2273_v40, %v2158_v4  ;;  %v2390_v44 = vmul.f32 %v2273_v40, %v2161_v5 }
  0xfd   : >> { %v2372_v23 = vsel %vm385_vm1, %v372_v30, 0.0  ;;  %v423_v31 = vmul.f32 %v2244_v25, %v2363_v41  ;;  %v2394_v50 = vmul.f32 %v2273_v40, %v2168_v6  ;;  %v2397_v47 = vadd.f32 %v405_v1, %v396_v21 }
  0xfe   : >> { %v397_v4 = vmul.f32 %v2253_v28, %v2363_v41  ;;  %v398_v5 = vmul.f32 %v2253_v28, %v2372_v23  ;;  %v476_v55 = vmul.f32 %v2256_v29, %v2340_v45  ;;  %v424_v6 = vmul.f32 %v2244_v25, %v2372_v23 }
  0xff   : >> { %445 = vrot.lane.b32.xlu0 %v423_v31, %s1904_s17  ;;  %v648_v0 = vpop.permute.xlu0 %647  ;;  %v650_v2 = vpop.permute.xlu1 %649  ;;  %v2408_v56 = vadd.f32 %v484_v19, %v475_v35  ;;  %v477_v1 = vmul.f32 %v2256_v29, %v2363_v41  ;;  %v550_v24 = vmul.f32 %v2263_v36, %v2269_v38  ;;  %v497_v21 = vmul.f32 %v2247_v26, %v2269_v38 }
 0x100   : >> { %443 = vrot.lane.b32.xlu1 %v422_v51, %s1904_s17  ;;  %v2417_v28 = vstv %s2042_s27  ;;  %v2421_v30 = vmul.f32 %v2273_v40, %v2171_v7  ;;  %v2424_v51 = vstv %s2040_s26  ;;  %v2426_v25 = vadd.f32 %v406_v32, %v397_v4 }
 0x101   : >> { %3723 = vst [vmem:[#allocation41_spill] sm:$0xff] %v2408_v56  ;;  %v552_v19 = vmul.f32 %v2263_v36, %v2266_v37  ;;  %v2431_v35 = vstv %s2038_s25  ;;  %v2434_v31 = vstv %s2068_s15  ;;  %v2437_v7 = vadd.f32 %v407_v46, %v398_v5 }
 0x102   : >> { %3724 = vst [vmem:[#allocation42_spill] sm:$0xff] %v2426_v25  ;;  %v2440_v40 = vadd.f32 %v2318_v20, %v476_v55  ;;  %v478_v32 = vmul.f32 %v2256_v29, %v2372_v23  ;;  %v2444_v4 = vadd.f32 %v486_v49, %v477_v1  ;;  %v551_v16 = vmul.f32 %v2263_v36, %v2307_v60 }
 0x103   : >> { %513 = vrot.lane.b32.xlu0 %v497_v21, %s1904_s17  ;;  %v652_v18 = vpop.permute.xlu0 %651  ;;  %v654_v17 = vpop.permute.xlu1 %653  ;;  %v2450_v56 = vadd.f32 %v2295_v54, %v550_v24  ;;  %v693_v46 = vmul.f32 %v2178_v8, %v2424_v51  ;;  %v2455_v5 = vstv %s2066_s14  ;;  %v499_v20 = vmul.f32 %v2247_v26, %v2266_v37 }
 0x104   : >> { %3726 = vst [vmem:[#allocation43_spill] sm:$0xff] %v2440_v40  ;;  %3727 = vst [vmem:[#allocation44_spill] sm:$0xff] %v2444_v4  ;;  %447 = vrot.lane.b32.xlu1 %v424_v6, %s1904_s17  ;;  %v2461_v29 = vmul.f32 %v2178_v8, %v2434_v31  ;;  %v2464_v49 = vstv %s2084_s9  ;;  %v2467_v55 = vstv %s3725_s0  ;;  %v498_v54 = vmul.f32 %v2247_v26, %v2307_v60  ;;  %s3772_s0 = sld [smem:[#allocation24_spill]] }
 0x105   : >> { %3728 = vst [vmem:[#allocation45_spill] sm:$0xff] %v2450_v56  ;;  %v663_v6 = vsel %vm368_vm0, %v648_v0, %v650_v2  ;;  %v2472_v1 = vadd.f32 %v487_v53, %v478_v32  ;;  %v694_v24 = vmul.f32 %v2181_v9, %v2424_v51  ;;  %v2478_v4 = vadd.f32 %v2328_v33, %v551_v16 }
 0x106   : >> { %v553_v40 = vmul.f32 %v2263_v36, %v2304_v59  ;;  %v2482_v62 = vadd.f32 %v561_v42, %v552_v19  ;;  %v554_v2 = vmul.f32 %v2263_v36, %v2331_v34  ;;  %v555_v53 = vmul.f32 %v2263_v36, %v2340_v45 }
 0x107   : >> { %3729 = vst [vmem:[#allocation46_spill] sm:$0xff] %v2472_v1  ;;  %517 = vrot.lane.b32.xlu0 %v499_v20, %s1904_s17  ;;  %v656_v21 = vpop.permute.xlu0 %655  ;;  %v658_v56 = vpop.permute.xlu1 %657  ;;  %3730 = vst [vmem:[#allocation47_spill] sm:$0xff] %v2478_v4  ;;  %v556_v32 = vmul.f32 %v2263_v36, %v2363_v41  ;;  %v695_v16 = vmul.f32 %v2188_v10, %v2424_v51  ;;  %v2495_v33 = vmul.f32 %v2181_v9, %v2434_v31 }
 0x108   : >> { %3731 = vst [vmem:[#allocation48_spill] sm:$0xff] %v2482_v62  ;;  %515 = vrot.lane.b32.xlu1 %v498_v54, %s1904_s17  ;;  %v501_v42 = vmul.f32 %v2247_v26, %v2331_v34  ;;  %v2500_v19 = vsel %vm385_vm1, %v663_v6, 0.0  ;;  %v664_v20 = vsel %vm368_vm0, %v652_v18, %v654_v17  ;;  %v696_v54 = vmul.f32 %v2191_v11, %v2424_v51 }
 0x109   : >> { %v500_v62 = vmul.f32 %v2247_v26, %v2304_v59  ;;  %v2508_v4 = vsel %vm368_vm0, 0.0, %v648_v0  ;;  %v665_v1 = vsel %vm368_vm0, %v656_v21, %v658_v56  ;;  %v2512_v39 = vadd.f32 %v2380_v43, %v553_v40 }
 0x10a   : >> { %v2516_v17 = vadd.f32 %v2386_v48, %v554_v2  ;;  %v2519_v22 = vadd.f32 %v2390_v44, %v555_v53  ;;  %v557_v25 = vmul.f32 %v2263_v36, %v2372_v23  ;;  %v2524_v0 = vadd.f32 %v2394_v50, %v556_v32 }
 0x10b   : >> { %521 = vrot.lane.b32.xlu0 %v501_v42, %s1904_s17  ;;  %v660_v6 = vpop.permute.xlu0 %659  ;;  %v662_v61 = vpop.permute.xlu1 %661  ;;  %v2528_v43 = vsel %vm385_vm1, %v664_v20, 0.0  ;;  %v684_v56 = vmul.f32 %v2431_v35, %v2508_v4  ;;  %v685_v48 = vmul.f32 %v2431_v35, %v2500_v19  ;;  %v697_v44 = vmul.f32 %v2198_v12, %v2424_v51 }
 0x10c   : >> { %3732 = vst [vmem:[#allocation49_spill] sm:$0xff] %v2516_v17  ;;  %3733 = vst [vmem:[#allocation50_spill] sm:$0xff] %v2524_v0  ;;  %519 = vrot.lane.b32.xlu1 %v500_v62, %s1904_s17  ;;  %v503_v36 = vmul.f32 %v2247_v26, %v2363_v41  ;;  %v502_v50 = vmul.f32 %v2247_v26, %v2340_v45  ;;  %v2541_v62 = vsel %vm385_vm1, %v665_v1, 0.0  ;;  %v2546_v2 = vsel %vm368_vm0, 0.0, %v652_v18 }
 0x10d   : >> { %v698_v40 = vmul.f32 %v2201_v13, %v2424_v51  ;;  %v2549_v53 = vsel %vm368_vm0, 0.0, %v656_v21  ;;  %v666_v32 = vsel %vm368_vm0, %v660_v6, %v662_v61  ;;  %v2553_v42 = vadd.f32 %v2421_v30, %v557_v25 }
 0x10e   : >> { %v2558_v0 = vadd.f32 %v693_v46, %v684_v56  ;;  %v2560_v17 = vadd.f32 %v694_v24, %v685_v48  ;;  %v686_v18 = vmul.f32 %v2431_v35, %v2546_v2  ;;  %v687_v21 = vmul.f32 %v2431_v35, %v2528_v43 }
 0x10f   : >> { %3734 = vst [vmem:[#allocation51_spill] sm:$0xff] %v2553_v42  ;;  %525 = vrot.lane.b32.xlu0 %v503_v36, %s1904_s17  ;;  %v2556_v20 = vpop.permute.xlu0 %963  ;;  %v966_v1 = vpop.permute.xlu1 %965  ;;  %v688_v30 = vmul.f32 %v2431_v35, %v2549_v53  ;;  %v689_v25 = vmul.f32 %v2431_v35, %v2541_v62  ;;  %v2575_v46 = vmul.f32 %v2178_v8, %v2467_v55  ;;  %v2580_v56 = vsel %vm385_vm1, %v666_v32, 0.0 }
 0x110   : >> { %3735 = vst [vmem:[#allocation52_spill] sm:$0xff] %v2558_v0  ;;  %3736 = vst [vmem:[#allocation53_spill] sm:$0xff] %v2560_v17  ;;  %523 = vrot.lane.b32.xlu1 %v502_v50, %s1904_s17  ;;  %v979_v61 = vsel %vm368_vm0, %v2556_v20, %v966_v1  ;;  %v576_v24 = vmul.f32 %v2250_v27, %v2269_v38  ;;  %v699_v36 = vmul.f32 %v2208_v14, %v2424_v51 }
 0x111   : >> { %v2583_v48 = vsel %vm385_vm1, %v979_v61, 0.0  ;;  %v504_v50 = vmul.f32 %v2247_v26, %v2372_v23  ;;  %v2590_v1 = vsel %vm368_vm0, 0.0, %v660_v6  ;;  %v2592_v8 = vadd.f32 %v695_v16, %v686_v18 }
 0x112   : >> { %v700_v38 = vmul.f32 %v2211_v15, %v2424_v51  ;;  %v2599_v0 = vadd.f32 %v696_v54, %v687_v21  ;;  %v2601_v17 = vadd.f32 %v697_v44, %v688_v30  ;;  %v2603_v42 = vadd.f32 %v698_v40, %v689_v25 }
 0x113   : >> { %592 = vrot.lane.b32.xlu0 %v576_v24, %s1904_s17  ;;  %v2597_v32 = vpop.permute.xlu0 %967  ;;  %v970_v61 = vpop.permute.xlu1 %969  ;;  %v690_v26 = vmul.f32 %v2431_v35, %v2590_v1  ;;  %v691_v51 = vmul.f32 %v2431_v35, %v2580_v56  ;;  %v771_v6 = vmul.f32 %v2455_v5, %v2508_v4  ;;  %v868_v54 = vmul.f32 %v2181_v9, %v2467_v55 }
 0x114   : >> { %527 = vrot.lane.b32.xlu1 %v504_v50, %s1904_s17  ;;  %v980_v16 = vsel %vm368_vm0, %v2597_v32, %v970_v61  ;;  %v578_v44 = vmul.f32 %v2250_v27, %v2266_v37  ;;  %v782_v18 = vmul.f32 %v2188_v10, %v2434_v31  ;;  %v869_v21 = vmul.f32 %v2188_v10, %v2467_v55 }
 0x115   : >> { %v2619_v40 = vsel %vm385_vm1, %v980_v16, 0.0  ;;  %v577_v35 = vmul.f32 %v2250_v27, %v2307_v60  ;;  %v2627_v30 = vadd.f32 %v699_v36, %v690_v26  ;;  %v783_v9 = vmul.f32 %v2191_v11, %v2434_v31 }
 0x116   : >> { %v784_v37 = vmul.f32 %v2198_v12, %v2434_v31  ;;  %v2636_v50 = vadd.f32 %v700_v38, %v691_v51  ;;  %v772_v10 = vmul.f32 %v2455_v5, %v2500_v19  ;;  %v2641_v60 = vadd.f32 %v2461_v29, %v771_v6 }
 0x117   : >> { %3737 = vst [vmem:[#allocation54_spill] sm:$0xff] %v2627_v30  ;;  %596 = vrot.lane.b32.xlu0 %v578_v44, %s1904_s17  ;;  %v2634_v25 = vpop.permute.xlu0 %971  ;;  %v974_v24 = vpop.permute.xlu1 %973  ;;  %v773_v36 = vmul.f32 %v2455_v5, %v2546_v2  ;;  %v774_v26 = vmul.f32 %v2455_v5, %v2528_v43  ;;  %v775_v38 = vmul.f32 %v2455_v5, %v2549_v53 }
 0x118   : >> { %3738 = vst [vmem:[#allocation55_spill] sm:$0xff] %v2641_v60  ;;  %594 = vrot.lane.b32.xlu1 %v577_v35, %s1904_s17  ;;  %v981_v61 = vsel %vm368_vm0, %v2634_v25, %v974_v24  ;;  %v870_v16 = vmul.f32 %v2191_v11, %v2467_v55  ;;  %v580_v29 = vmul.f32 %v2250_v27, %v2331_v34 }
 0x119   : >> { %v2657_v51 = vsel %vm385_vm1, %v981_v61, 0.0  ;;  %v785_v6 = vmul.f32 %v2201_v13, %v2434_v31  ;;  %v871_v44 = vmul.f32 %v2198_v12, %v2467_v55  ;;  %v579_v35 = vmul.f32 %v2250_v27, %v2304_v59 }
 0x11a   : >> { %v2666_v24 = vadd.f32 %v2495_v33, %v772_v10  ;;  %v786_v11 = vmul.f32 %v2208_v14, %v2434_v31  ;;  %v787_v34 = vmul.f32 %v2211_v15, %v2434_v31  ;;  %v2675_v30 = vadd.f32 %v782_v18, %v773_v36 }
 0x11b   : >> { %600 = vrot.lane.b32.xlu0 %v580_v29, %s1904_s17  ;;  %v2673_v61 = vpop.permute.xlu0 %975  ;;  %v978_v60 = vpop.permute.xlu1 %977  ;;  %v2677_v12 = vadd.f32 %v783_v9, %v774_v26  ;;  %v776_v59 = vmul.f32 %v2455_v5, %v2541_v62  ;;  %v2681_v33 = vadd.f32 %v784_v37, %v775_v38  ;;  %v777_v31 = vmul.f32 %v2455_v5, %v2590_v1 }
 0x11c   : >> { %598 = vrot.lane.b32.xlu1 %v579_v35, %s1904_s17  ;;  %v982_v10 = vsel %vm368_vm0, %v2673_v61, %v978_v60  ;;  %v778_v29 = vmul.f32 %v2455_v5, %v2580_v56  ;;  %v872_v18 = vmul.f32 %v2201_v13, %v2467_v55  ;;  %v582_v9 = vmul.f32 %v2250_v27, %v2363_v41 }
 0x11d   : >> { %v2695_v37 = vsel %vm385_vm1, %v982_v10, 0.0  ;;  %v873_v36 = vmul.f32 %v2208_v14, %v2467_v55  ;;  %v874_v60 = vmul.f32 %v2211_v15, %v2467_v55  ;;  %v581_v26 = vmul.f32 %v2250_v27, %v2340_v45 }
 0x11e   : >> { %v710_v5 = vmul.f32 %v2417_v28, %v2508_v4  ;;  %v583_v13 = vmul.f32 %v2250_v27, %v2372_v23  ;;  %v2707_v38 = vadd.f32 %v785_v6, %v776_v59  ;;  %v2710_v41 = vadd.f32 %v786_v11, %v777_v31 }
 0x11f   : >> { %604 = vrot.lane.b32.xlu0 %v582_v9, %s1904_s17  ;;  %v2712_v35 = vadd.f32 %v787_v34, %v778_v29  ;;  %v858_v14 = vmul.f32 %v2464_v49, %v2508_v4  ;;  %v859_v15 = vmul.f32 %v2464_v49, %v2500_v19  ;;  %v860_v45 = vmul.f32 %v2464_v49, %v2546_v2 }
 0x120   : >> { %602 = vrot.lane.b32.xlu1 %v581_v26, %s1904_s17  ;;  %v861_v27 = vmul.f32 %v2464_v49, %v2528_v43  ;;  %v862_v23 = vmul.f32 %v2464_v49, %v2549_v53  ;;  %v863_v55 = vmul.f32 %v2464_v49, %v2541_v62  ;;  %v864_v34 = vmul.f32 %v2464_v49, %v2590_v1 }
 0x121   : >> { %v2728_v6 = vadd.f32 %v2575_v46, %v858_v14  ;;  %v2730_v11 = vadd.f32 %v868_v54, %v859_v15  ;;  %v865_v59 = vmul.f32 %v2464_v49, %v2580_v56  ;;  %v2736_v10 = vadd.f32 %v869_v21, %v860_v45 }
 0x122   : >> { %v2738_v31 = vadd.f32 %v870_v16, %v861_v27  ;;  %v2740_v29 = vadd.f32 %v871_v44, %v862_v23  ;;  %v2742_v9 = vadd.f32 %v872_v18, %v863_v55  ;;  %v712_v46 = vmul.f32 %v2417_v28, %v2546_v2 }
 0x123   : >> { %726 = vrot.lane.b32.xlu0 %v710_v5, %s1904_s17  ;;  %v2747_v54 = vadd.f32 %v873_v36, %v864_v34  ;;  %v2749_v26 = vadd.f32 %v874_v60, %v865_v59  ;;  %v711_v49 = vmul.f32 %v2417_v28, %v2500_v19  ;;  %v714_v21 = vmul.f32 %v2417_v28, %v2549_v53 }
 0x124   : >> { %606 = vrot.lane.b32.xlu1 %v583_v13, %s1904_s17  ;;  %v713_v16 = vmul.f32 %v2417_v28, %v2528_v43  ;;  %v716_v44 = vmul.f32 %v2417_v28, %v2590_v1  ;;  %v715_v18 = vmul.f32 %v2417_v28, %v2541_v62  ;;  %v796_v36 = vstv %s2070_s16 }
 0x125   : >> { %3739 = vst [vmem:[#allocation56_spill] sm:$0xff] %v2747_v54  ;;  %3740 = vst [vmem:[#allocation57_spill] sm:$0xff] %v2749_v26  ;;  %v717_v60 = vmul.f32 %v2417_v28, %v2580_v56  ;;  %v797_v5 = vmul.f32 %v796_v36, %v2508_v4  ;;  %v799_v13 = vmul.f32 %v796_v36, %v2546_v2  ;;  %v883_v23 = vstv %s3741_s1  ;;  %v3760_v26 = vld [vmem:[#allocation53_spill] sm:$0xff]  ;;  %s3774_s1 = sld [smem:[#allocation13_spill]] }
 0x126   : >> { %v798_v14 = vmul.f32 %v796_v36, %v2500_v19  ;;  %v801_v15 = vmul.f32 %v796_v36, %v2549_v53  ;;  %v800_v45 = vmul.f32 %v796_v36, %v2528_v43  ;;  %v803_v28 = vmul.f32 %v796_v36, %v2590_v1 }
 0x127   : >> { %730 = vrot.lane.b32.xlu0 %v712_v46, %s1904_s17  ;;  %v802_v27 = vmul.f32 %v796_v36, %v2541_v62  ;;  %v884_v55 = vmul.f32 %v883_v23, %v2508_v4  ;;  %v804_v34 = vmul.f32 %v796_v36, %v2580_v56  ;;  %v886_v59 = vmul.f32 %v883_v23, %v2546_v2 }
 0x128   : >> { %728 = vrot.lane.b32.xlu1 %v711_v49, %s1904_s17  ;;  %v885_v46 = vmul.f32 %v883_v23, %v2500_v19  ;;  %v888_v49 = vmul.f32 %v883_v23, %v2549_v53  ;;  %v2801_v4 = vsel %vm368_vm0, 0.0, %v2556_v20  ;;  %v890_v2 = vmul.f32 %v883_v23, %v2590_v1 }
 0x129   : >> { %v889_v19 = vmul.f32 %v883_v23, %v2541_v62  ;;  %v891_v53 = vmul.f32 %v883_v23, %v2580_v56  ;;  %v2819_v62 = vsel %vm368_vm0, 0.0, %v2634_v25  ;;  %v2827_v56 = vsel %vm368_vm0, 0.0, %v2673_v61 }
 0x12b   : >> { %734 = vrot.lane.b32.xlu0 %v714_v21, %s1904_s17  ;;  %v887_v21 = vmul.f32 %v883_v23, %v2528_v43  ;;  %v2811_v43 = vsel %vm368_vm0, 0.0, %v2597_v32 }
 0x12c   : >> { %732 = vrot.lane.b32.xlu1 %v713_v16, %s1904_s17  ;;  %v1025_v16 = vstv %s2048_s22 }
 0x12d   : >> { %v1028_v20 = vmul.f32 %v1025_v16, %v2811_v43  ;;  %v1027_v1 = vmul.f32 %v1025_v16, %v2583_v48  ;;  %v1030_v32 = vmul.f32 %v1025_v16, %v2819_v62  ;;  %v1032_v36 = vmul.f32 %v1025_v16, %v2827_v56 }
 0x12e   : >> { %v1031_v25 = vmul.f32 %v1025_v16, %v2657_v51 }
 0x12f   : >> { %738 = vrot.lane.b32.xlu0 %v716_v44, %s1904_s17  ;;  %v1026_v44 = vmul.f32 %v1025_v16, %v2801_v4 }
 0x130   : >> { %736 = vrot.lane.b32.xlu1 %v715_v18, %s1904_s17  ;;  %v1029_v18 = vmul.f32 %v1025_v16, %v2619_v40 }
 0x133   : >> { %813 = vrot.lane.b32.xlu0 %v797_v5, %s1904_s17  ;;  %v1033_v5 = vmul.f32 %v1025_v16, %v2695_v37 }
 0x134   : >> { %740 = vrot.lane.b32.xlu1 %v717_v60, %s1904_s17  ;;  %v1112_v60 = vstv %s3742_s2  ;;  %s3743_s2 = sld [smem:[#allocation25_spill]] }
 0x135   : >> { %v1113_v61 = vmul.f32 %v1112_v60, %v2801_v4  ;;  %v1116_v23 = vmul.f32 %v1112_v60, %v2619_v40  ;;  %v1118_v16 = vmul.f32 %v1112_v60, %v2657_v51 }
 0x137   : >> { %817 = vrot.lane.b32.xlu0 %v799_v13, %s1904_s17 }
 0x138   : >> { %815 = vrot.lane.b32.xlu1 %v798_v14, %s1904_s17  ;;  %v1115_v14 = vmul.f32 %v1112_v60, %v2811_v43 }
 0x13b   : >> { %821 = vrot.lane.b32.xlu0 %v801_v15, %s1904_s17  ;;  %v1114_v15 = vmul.f32 %v1112_v60, %v2583_v48 }
 0x13c   : >> { %819 = vrot.lane.b32.xlu1 %v800_v45, %s1904_s17 }
 0x13f   : >> { %825 = vrot.lane.b32.xlu0 %v803_v28, %s1904_s17  ;;  %v1117_v28 = vmul.f32 %v1112_v60, %v2819_v62 }
 0x140   : >> { %823 = vrot.lane.b32.xlu1 %v802_v27, %s1904_s17 }
 0x143   : >> { %900 = vrot.lane.b32.xlu0 %v884_v55, %s1904_s17 }
 0x144   : >> { %827 = vrot.lane.b32.xlu1 %v804_v34, %s1904_s17 }
 0x147   : >> { %904 = vrot.lane.b32.xlu0 %v886_v59, %s1904_s17 }
 0x148   : >> { %902 = vrot.lane.b32.xlu1 %v885_v46, %s1904_s17 }
 0x14b   : >> { %908 = vrot.lane.b32.xlu0 %v888_v49, %s1904_s17  ;;  %v1119_v49 = vmul.f32 %v1112_v60, %v2827_v56 }
 0x14c   : >> { %906 = vrot.lane.b32.xlu1 %v887_v21, %s1904_s17 }
 0x14f   : >> { %912 = vrot.lane.b32.xlu0 %v890_v2, %s1904_s17  ;;  %v1199_v2 = vstv %s3743_s2  ;;  %s3770_s2 = sld [smem:[#allocation18_spill]] }
 0x150   : >> { %910 = vrot.lane.b32.xlu1 %v889_v19, %s1904_s17 }
 0x153   : >> { %1042 = vrot.lane.b32.xlu0 %v1026_v44, %s1904_s17 }
 0x154   : >> { %914 = vrot.lane.b32.xlu1 %v891_v53, %s1904_s17  ;;  %v1200_v53 = vmul.f32 %v1199_v2, %v2801_v4 }
 0x157   : >> { %1046 = vrot.lane.b32.xlu0 %v1028_v20, %s1904_s17 }
 0x158   : >> { %1044 = vrot.lane.b32.xlu1 %v1027_v1, %s1904_s17  ;;  %v1120_v1 = vmul.f32 %v1112_v60, %v2695_v37 }
 0x15b   : >> { %1050 = vrot.lane.b32.xlu0 %v1030_v32, %s1904_s17 }
 0x15c   : >> { %1048 = vrot.lane.b32.xlu1 %v1029_v18, %s1904_s17 }
 0x15f   : >> { %1054 = vrot.lane.b32.xlu0 %v1032_v36, %s1904_s17  ;;  %v1202_v36 = vmul.f32 %v1199_v2, %v2811_v43 }
 0x160   : >> { %1052 = vrot.lane.b32.xlu1 %v1031_v25, %s1904_s17 }
 0x163   : >> { %1129 = vrot.lane.b32.xlu0 %v1113_v61, %s1904_s17 }
 0x164   : >> { %1056 = vrot.lane.b32.xlu1 %v1033_v5, %s1904_s17  ;;  %v1201_v5 = vmul.f32 %v1199_v2, %v2583_v48 }
 0x165   : >> { %v434_v13 = vpop.permute.xlu0 %433 }
 0x167   : >> { %1133 = vrot.lane.b32.xlu0 %v1115_v14, %s1904_s17  ;;  %v1204_v14 = vmul.f32 %v1199_v2, %v2819_v62 }
 0x168   : >> { %1131 = vrot.lane.b32.xlu1 %v1114_v15, %s1904_s17 }
 0x169   : >> { %v438_v45 = vpop.permute.xlu0 %437 }
 0x16a   : >> { %v436_v27 = vpop.permute.xlu1 %435 }
 0x16b   : >> { %v450_v55 = vsel %vm449_vm2, %v434_v13, %v436_v27  ;;  %v2849_v34 = vadd.f32 %v436_v27, %v2350_v52  ;;  %1137 = vrot.lane.b32.xlu0 %v1117_v28, %s1904_s17  ;;  %v3745_v27 = vld [vmem:[#allocation39_spill] sm:$0xff] }
 0x16c   : >> { %v2853_v59 = vadd.f32 %v450_v55, %v2299_v57  ;;  %1135 = vrot.lane.b32.xlu1 %v1116_v23, %s1904_s17 }
 0x16d   : >> { %v442_v46 = vpop.permute.xlu0 %441 }
 0x16e   : >> { %v440_v21 = vpop.permute.xlu1 %439 }
 0x16f   : >> { %v451_v19 = vsel %vm449_vm2, %v438_v45, %v440_v21  ;;  %v2861_v44 = vadd.f32 %v440_v21, %v2354_v63  ;;  %1141 = vrot.lane.b32.xlu0 %v1119_v49, %s1904_s17  ;;  %v1203_v45 = vmul.f32 %v1199_v2, %v2619_v40  ;;  %v1206_v49 = vmul.f32 %v1199_v2, %v2827_v56 }
 0x170   : >> { %v2865_v52 = vadd.f32 %v451_v19, %v2301_v58  ;;  %1139 = vrot.lane.b32.xlu1 %v1118_v16, %s1904_s17  ;;  %v1205_v16 = vmul.f32 %v1199_v2, %v2657_v51 }
 0x171   : >> { %v446_v57 = vpop.permute.xlu0 %445 }
 0x172   : >> { %v444_v20 = vpop.permute.xlu1 %443 }
 0x173   : >> { %v452_v32 = vsel %vm449_vm2, %v442_v46, %v444_v20  ;;  %v2872_v18 = vadd.f32 %v444_v20, %v2397_v47  ;;  %1216 = vrot.lane.b32.xlu0 %v1200_v53, %s1904_s17  ;;  %v3744_v47 = vld [vmem:[#allocation42_spill] sm:$0xff] }
 0x174   : >> { %v2876_v63 = vadd.f32 %v452_v32, %v2382_v3  ;;  %1143 = vrot.lane.b32.xlu1 %v1120_v1, %s1904_s17  ;;  %v3748_v20 = vld [vmem:[#allocation38_spill] sm:$0xff] }
 0x175   : >> { %v514_v58 = vpop.permute.xlu0 %513 }
 0x176   : >> { %v448_v25 = vpop.permute.xlu1 %447 }
 0x177   : >> { %v453_v60 = vsel %vm449_vm2, %v446_v57, %v448_v25  ;;  %v2883_v61 = vadd.f32 %v448_v25, %v2437_v7  ;;  %1220 = vrot.lane.b32.xlu0 %v1202_v36, %s1904_s17  ;;  %v3746_v7 = vld [vmem:[#allocation37_spill] sm:$0xff]  ;;  %v3747_v57 = vld [vmem:[#allocation40_spill] sm:$0xff]  ;;  %v1207_v36 = vmul.f32 %v1199_v2, %v2695_v37 }
 0x178   : >> { %v2887_v13 = vadd.f32 %v453_v60, %v3744_v47  ;;  %1218 = vrot.lane.b32.xlu1 %v1201_v5, %s1904_s17  ;;  %v3749_v5 = vld [vmem:[#allocation43_spill] sm:$0xff]  ;;  %v3750_v47 = vld [vmem:[#allocation41_spill] sm:$0xff] }
 0x179   : >> { %v518_v3 = vpop.permute.xlu0 %517 }
 0x17a   : >> { %v516_v15 = vpop.permute.xlu1 %515 }
 0x17b   : >> { %v529_v28 = vsel %vm449_vm2, %v514_v58, %v516_v15  ;;  %v2894_v23 = vadd.f32 %v516_v15, %v3745_v27  ;;  %1224 = vrot.lane.b32.xlu0 %v1204_v14, %s1904_s17 }
 0x17c   : >> { %v2898_v55 = vadd.f32 %v529_v28, %v3746_v7  ;;  %1222 = vrot.lane.b32.xlu1 %v1203_v45, %s1904_s17  ;;  %v3751_v28 = vld [vmem:[#allocation46_spill] sm:$0xff]  ;;  %v3752_v7 = vld [vmem:[#allocation44_spill] sm:$0xff] }
 0x17d   : >> { %v522_v46 = vpop.permute.xlu0 %521 }
 0x17e   : >> { %v520_v21 = vpop.permute.xlu1 %519 }
 0x17f   : >> { %v530_v19 = vsel %vm449_vm2, %v518_v3, %v520_v21  ;;  %v2905_v53 = vadd.f32 %v520_v21, %v3747_v57  ;;  %1228 = vrot.lane.b32.xlu0 %v1206_v49, %s1904_s17  ;;  %v3754_v57 = vld [vmem:[#allocation45_spill] sm:$0xff] }
 0x180   : >> { %v2909_v1 = vadd.f32 %v530_v19, %v3748_v20  ;;  %1226 = vrot.lane.b32.xlu1 %v1205_v16, %s1904_s17  ;;  %v3753_v16 = vld [vmem:[#allocation47_spill] sm:$0xff] }
 0x181   : >> { %v526_v32 = vpop.permute.xlu0 %525 }
 0x182   : >> { %v524_v58 = vpop.permute.xlu1 %523 }
 0x183   : >> { %v531_v25 = vsel %vm449_vm2, %v522_v46, %v524_v58  ;;  %v2915_v60 = vadd.f32 %v524_v58, %v3749_v5  ;;  %v3755_v5 = vld [vmem:[#allocation48_spill] sm:$0xff] }
 0x184   : >> { %v2918_v3 = vadd.f32 %v531_v25, %v3750_v47  ;;  %1230 = vrot.lane.b32.xlu1 %v1207_v36, %s1904_s17  ;;  %s3769_s17 = sld [smem:[#allocation14_spill]] }
 0x185   : >> { %v593_v14 = vpop.permute.xlu0 %592 }
 0x186   : >> { %v528_v15 = vpop.permute.xlu1 %527 }
 0x187   : >> { %v532_v45 = vsel %vm449_vm2, %v526_v32, %v528_v15  ;;  %v2923_v27 = vadd.f32 %v528_v15, %v3751_v28 }
 0x188   : >> { %v2926_v49 = vadd.f32 %v532_v45, %v3752_v7  ;;  %v3757_v7 = vld [vmem:[#allocation49_spill] sm:$0xff] }
 0x189   : >> { %v597_v2 = vpop.permute.xlu0 %596 }
 0x18a   : >> { %v595_v46 = vpop.permute.xlu1 %594 }
 0x18b   : >> { %v608_v21 = vsel %vm449_vm2, %v593_v14, %v595_v46  ;;  %v2930_v19 = vadd.f32 %v595_v46, %v3753_v16 }
 0x18c   : >> { %v2933_v20 = vadd.f32 %v608_v21, %v3754_v57  ;;  %v3758_v57 = vld [vmem:[#allocation51_spill] sm:$0xff] }
 0x18d   : >> { %v601_v58 = vpop.permute.xlu0 %600 }
 0x18e   : >> { %v599_v36 = vpop.permute.xlu1 %598 }
 0x18f   : >> { %v609_v32 = vsel %vm449_vm2, %v597_v2, %v599_v36  ;;  %v2937_v25 = vadd.f32 %v599_v36, %v2512_v39  ;;  %v3759_v36 = vld [vmem:[#allocation50_spill] sm:$0xff] }
 0x190   : >> { %v2940_v47 = vadd.f32 %v609_v32, %v3755_v5 }
 0x191   : >> { %v605_v15 = vpop.permute.xlu0 %604 }
 0x192   : >> { %v603_v45 = vpop.permute.xlu1 %602 }
 0x193   : >> { %v610_v14 = vsel %vm449_vm2, %v601_v58, %v603_v45  ;;  %v2944_v28 = vadd.f32 %v603_v45, %v2519_v22  ;;  %v3761_v45 = vld [vmem:[#allocation52_spill] sm:$0xff] }
 0x194   : >> { %v2947_v46 = vadd.f32 %v610_v14, %v3757_v7 }
 0x195   : >> { %3756 = vst [vmem:[#allocation42_spill] sm:$0xff] %v2944_v28  ;;  %v727_v21 = vpop.permute.xlu0 %726 }
 0x196   : >> { %v607_v16 = vpop.permute.xlu1 %606 }
 0x197   : >> { %v611_v2 = vsel %vm449_vm2, %v605_v15, %v607_v16  ;;  %v2951_v39 = vadd.f32 %v607_v16, %v3758_v57 }
 0x198   : >> { %v2954_v32 = vadd.f32 %v611_v2, %v3759_v36 }
 0x199   : >> { %v731_v5 = vpop.permute.xlu0 %730 }
 0x19a   : >> { %v729_v54 = vpop.permute.xlu1 %728 }
 0x19b   : >> { %v742_v58 = vsel %vm449_vm2, %v727_v21, %v729_v54  ;;  %v755_v22 = vadd.f32 %v729_v54, %v3760_v26 }
 0x19c   : >> { %v754_v28 = vadd.f32 %v742_v58, %v3761_v45  ;;  %v3766_v45 = vld [vmem:[#allocation54_spill] sm:$0xff] }
 0x19d   : >> { %v2960_v14 = vadd.f32 %v755_v22, %v2849_v34  ;;  %v735_v7 = vpop.permute.xlu0 %734 }
 0x19e   : >> { %v2963_v15 = vadd.f32 %v754_v28, %v2853_v59  ;;  %v733_v16 = vpop.permute.xlu1 %732 }
 0x19f   : >> { %v743_v57 = vsel %vm449_vm2, %v731_v5, %v733_v16  ;;  %v757_v2 = vadd.f32 %v733_v16, %v2599_v0 }
 0x1a0   : >> { %v756_v36 = vadd.f32 %v743_v57, %v2592_v8 }
 0x1a1   : >> { %v2969_v21 = vadd.f32 %v757_v2, %v2861_v44  ;;  %v739_v54 = vpop.permute.xlu0 %738  ;;  %v3771_v2 = vld [vmem:[#allocation55_spill] sm:$0xff] }
 0x1a2   : >> { %v2972_v26 = vadd.f32 %v756_v36, %v2865_v52  ;;  %v737_v34 = vpop.permute.xlu1 %736 }
 0x1a3   : >> { %3762 = vst [vmem:[#allocation39_spill] sm:$0xff] %v2969_v21  ;;  %v744_v58 = vsel %vm449_vm2, %v735_v7, %v737_v34  ;;  %v759_v59 = vadd.f32 %v737_v34, %v2603_v42 }
 0x1a4   : >> { %3763 = vst [vmem:[#allocation37_spill] sm:$0xff] %v2972_v26  ;;  %v758_v28 = vadd.f32 %v744_v58, %v2601_v17 }
 0x1a5   : >> { %v2978_v5 = vadd.f32 %v759_v59, %v2872_v18  ;;  %v814_v0 = vpop.permute.xlu0 %813 }
 0x1a6   : >> { %v2981_v8 = vadd.f32 %v758_v28, %v2876_v63  ;;  %v741_v44 = vpop.permute.xlu1 %740 }
 0x1a7   : >> { %3764 = vst [vmem:[#allocation40_spill] sm:$0xff] %v2978_v5  ;;  %v745_v22 = vsel %vm449_vm2, %v739_v54, %v741_v44  ;;  %v761_v52 = vadd.f32 %v741_v44, %v2636_v50  ;;  %v3011_v44 = vstv %s3769_s17  ;;  %s3808_s17 = sld [smem:[#allocation31_spill]] }
 0x1a8   : >> { %3765 = vst [vmem:[#allocation38_spill] sm:$0xff] %v2981_v8  ;;  %v760_v16 = vadd.f32 %v745_v22, %v3766_v45  ;;  %v3024_v45 = vstv %s3776_s6  ;;  %s3806_s6 = sld [smem:[#allocation28_spill]] }
 0x1a9   : >> { %v2987_v7 = vadd.f32 %v761_v52, %v2883_v61  ;;  %v818_v42 = vpop.permute.xlu0 %817 }
 0x1aa   : >> { %v2990_v17 = vadd.f32 %v760_v16, %v2887_v13  ;;  %v816_v18 = vpop.permute.xlu1 %815 }
 0x1ab   : >> { %3767 = vst [vmem:[#allocation43_spill] sm:$0xff] %v2987_v7  ;;  %v829_v63 = vsel %vm449_vm2, %v814_v0, %v816_v18  ;;  %v842_v57 = vadd.f32 %v816_v18, %v2666_v24 }
 0x1ac   : >> { %3768 = vst [vmem:[#allocation41_spill] sm:$0xff] %v2990_v17  ;;  %v841_v36 = vadd.f32 %v829_v63, %v3771_v2  ;;  %v3036_v63 = vstv %s3778_s7  ;;  %v3783_v2 = vld [vmem:[#allocation35_spill] sm:$0xff]  ;;  %s3800_s7 = sld [smem:[#allocation27_spill]] }
 0x1ad   : >> { %v2996_v50 = vadd.f32 %v842_v57, %v2894_v23  ;;  %v822_v54 = vpop.permute.xlu0 %821 }
 0x1ae   : >> { %v2999_v61 = vadd.f32 %v841_v36, %v2898_v55  ;;  %v820_v13 = vpop.permute.xlu1 %819  ;;  %v3014_v55 = vstv %s3770_s2  ;;  %s3810_s2 = sld [smem:[#allocation32_spill]] }
 0x1af   : >> { %3773 = vst [vmem:[#allocation46_spill] sm:$0xff] %v2996_v50  ;;  %v830_v34 = vsel %vm449_vm2, %v818_v42, %v820_v13  ;;  %v844_v58 = vadd.f32 %v820_v13, %v2677_v12  ;;  %v3019_v12 = vstv %s3772_s0  ;;  %v3781_v42 = vld [vmem:[#allocation34_spill] sm:$0xff]  ;;  %v3045_v36 = vmul.f32 %v3783_v2, %v3014_v55  ;;  %s3795_s0 = sld [smem:[#allocation26_spill]] }
 0x1b0   : >> { %3775 = vst [vmem:[#allocation44_spill] sm:$0xff] %v2999_v61  ;;  %v843_v59 = vadd.f32 %v830_v34, %v2675_v30  ;;  %v1009_v18 = vmul.f32 %v3781_v42, %v3011_v44 }
 0x1b1   : >> { %v3005_v24 = vadd.f32 %v844_v58, %v2905_v53  ;;  %v826_v28 = vpop.permute.xlu0 %825  ;;  %v999_v53 = vstv %s3774_s1  ;;  %s3798_s1 = sld [smem:[#allocation29_spill]] }
 0x1b2   : >> { %v3008_v23 = vadd.f32 %v843_v59, %v2909_v1  ;;  %v824_v0 = vpop.permute.xlu1 %823  ;;  %v1804_v59 = vld [vmem:[%s2135_s19 + $0x88] sm:$0xff]  ;;  %v1006_v17 = vmul.f32 %v999_v53, %v2827_v56 }
 0x1b3   : >> { %3777 = vst [vmem:[#allocation47_spill] sm:$0xff] %v3005_v24  ;;  %v831_v22 = vsel %vm449_vm2, %v822_v54, %v824_v0  ;;  %v846_v52 = vadd.f32 %v824_v0, %v2707_v38  ;;  %v3033_v38 = vmul.f32 %v3781_v42, %v3014_v55  ;;  %v3049_v54 = vmul.f32 %v3781_v42, %v3019_v12 }
 0x1b4   : >> { %3779 = vst [vmem:[#allocation45_spill] sm:$0xff] %v3008_v23  ;;  %v845_v30 = vadd.f32 %v831_v22, %v2681_v33  ;;  %v3057_v0 = vmul.f32 %v1804_v59, %v3019_v12  ;;  %v1002_v23 = vmul.f32 %v999_v53, %v2811_v43 }
 0x1b5   : >> { %v3027_v1 = vadd.f32 %v846_v52, %v2915_v60  ;;  %v901_v16 = vpop.permute.xlu0 %900  ;;  %v1010_v60 = vmul.f32 %v3783_v2, %v3011_v44  ;;  %v1805_v52 = vld [vmem:[%s2135_s19 + $0x98] sm:$0xff]  ;;  %v1806_v2 = vld [vmem:[%s2135_s19 + $0x90] sm:$0xff] }
 0x1b6   : >> { %v3039_v33 = vadd.f32 %v845_v30, %v2918_v3  ;;  %v828_v57 = vpop.permute.xlu1 %827  ;;  %v3784_v3 = vld [vmem:[#allocation36_spill] sm:$0xff]  ;;  %v1012_v30 = vmul.f32 %v1805_v52, %v3011_v44  ;;  %v3064_v42 = vmul.f32 %v1806_v2, %v3014_v55 }
 0x1b7   : >> { %3780 = vst [vmem:[#allocation48_spill] sm:$0xff] %v3027_v1  ;;  %v832_v13 = vsel %vm449_vm2, %v826_v28, %v828_v57  ;;  %v848_v34 = vadd.f32 %v828_v57, %v2712_v35  ;;  %v1011_v58 = vmul.f32 %v3784_v3, %v3011_v44  ;;  %v3067_v28 = vmul.f32 %v1806_v2, %v3019_v12  ;;  %v1807_v3 = vld [vmem:[%s2135_s19 + $0xa0] sm:$0xff] }
 0x1b8   : >> { %3782 = vst [vmem:[#allocation49_spill] sm:$0xff] %v3039_v33  ;;  %v847_v22 = vadd.f32 %v832_v13, %v2710_v41  ;;  %v1013_v59 = vmul.f32 %v1807_v3, %v3011_v44  ;;  %v3075_v41 = vmul.f32 %v1805_v52, %v3014_v55  ;;  %v3078_v13 = vmul.f32 %v1805_v52, %v3019_v12 }
 0x1b9   : >> { %v3070_v35 = vadd.f32 %v848_v34, %v2923_v27  ;;  %v905_v57 = vpop.permute.xlu0 %904  ;;  %v1000_v2 = vmul.f32 %v999_v53, %v2801_v4  ;;  %v1001_v27 = vmul.f32 %v999_v53, %v2583_v48  ;;  %v1100_v34 = vmul.f32 %v1807_v3, %v3014_v55 }
 0x1ba   : >> { %3786 = vst [vmem:[#allocation50_spill] sm:$0xff] %v3078_v13  ;;  %v3081_v1 = vadd.f32 %v847_v22, %v2926_v49  ;;  %v903_v33 = vpop.permute.xlu1 %902  ;;  %v1003_v52 = vmul.f32 %v999_v53, %v2619_v40  ;;  %v1004_v49 = vmul.f32 %v999_v53, %v2819_v62  ;;  %v3093_v22 = vld [vmem:[%s2135_s19 + $0xa8] sm:$0xff]  ;;  %v3098_v61 = vmul.f32 %v1807_v3, %v3019_v12  ;;  %v1810_v13 = vld [vmem:[%s2135_s19 + $0xb8] sm:$0x1] }
 0x1bb   : >> { %3785 = vst [vmem:[#allocation51_spill] sm:$0xff] %v3070_v35  ;;  %v916_v35 = vsel %vm449_vm2, %v901_v16, %v903_v33  ;;  %v929_v24 = vadd.f32 %v903_v33, %v2730_v11  ;;  %v1005_v33 = vmul.f32 %v999_v53, %v2657_v51  ;;  %v3113_v3 = vadd.f32 %v1009_v18, %v1000_v2 }
 0x1bc   : >> { %3787 = vst [vmem:[#allocation53_spill] sm:$0xff] %v3081_v1  ;;  %v928_v50 = vadd.f32 %v916_v35, %v2728_v6  ;;  %v1014_v1 = vmul.f32 %v3093_v22, %v3011_v44  ;;  %3788 = vst [vmem:[#allocation52_spill] sm:$0xff] %v3098_v61  ;;  %v3106_v6 = vld [vmem:[%s2135_s19 + $0xb0] sm:$0x1]  ;;  %v1018_v5 = vadd.f32 %v1010_v60, %v1001_v27  ;;  %s3804_s19 = sld [smem:[#allocation30_spill]] }
 0x1bd   : >> { %v3101_v16 = vadd.f32 %v929_v24, %v2930_v19  ;;  %v909_v11 = vpop.permute.xlu0 %908  ;;  %v1015_v35 = vmul.f32 %v3106_v6, %v3011_v44  ;;  %v1101_v19 = vmul.f32 %v3093_v22, %v3014_v55  ;;  %v3119_v26 = vadd.f32 %v1011_v58, %v1002_v23 }
 0x1be   : >> { %v3111_v7 = vadd.f32 %v928_v50, %v2933_v20  ;;  %v907_v8 = vpop.permute.xlu1 %906  ;;  %v3121_v21 = vadd.f32 %v1012_v30, %v1003_v52  ;;  %v1016_v20 = vmul.f32 %v1810_v13, %v3011_v44  ;;  %v1007_v50 = vmul.f32 %v999_v53, %v2695_v37  ;;  %v3790_v52 = vld [vmem:[#allocation42_spill] sm:$0xff] }
 0x1bf   : >> { %3789 = vst [vmem:[#allocation54_spill] sm:$0xff] %v3101_v16  ;;  %v917_v24 = vsel %vm449_vm2, %v905_v57, %v907_v8  ;;  %v931_v16 = vadd.f32 %v907_v8, %v2738_v31  ;;  %v1087_v18 = vmul.f32 %v3024_v45, %v2801_v4  ;;  %v3132_v2 = vadd.f32 %v1013_v59, %v1004_v49 }
 0x1c0   : >> { %v930_v61 = vadd.f32 %v917_v24, %v2736_v10  ;;  %v3134_v31 = vadd.f32 %v1014_v1, %v1005_v33  ;;  %v3136_v8 = vadd.f32 %v1015_v35, %v1006_v17  ;;  %v1088_v44 = vmul.f32 %v3024_v45, %v2583_v48 }
 0x1c1   : >> { %v3130_v60 = vadd.f32 %v931_v16, %v2937_v25  ;;  %v913_v57 = vpop.permute.xlu0 %912  ;;  %v1089_v53 = vmul.f32 %v3024_v45, %v2811_v43  ;;  %v1090_v25 = vmul.f32 %v3024_v45, %v2619_v40  ;;  %v1091_v17 = vmul.f32 %v3024_v45, %v2819_v62 }
 0x1c2   : >> { %v3139_v10 = vadd.f32 %v930_v61, %v2940_v47  ;;  %v911_v23 = vpop.permute.xlu1 %910  ;;  %v1092_v47 = vmul.f32 %v3024_v45, %v2657_v51  ;;  %v3154_v30 = vadd.f32 %v1016_v20, %v1007_v50  ;;  %v3157_v59 = vadd.f32 %v3033_v38, %v1087_v18  ;;  %v3793_v50 = vld [vmem:[#allocation57_spill] sm:$0xff] }
 0x1c3   : >> { %v918_v58 = vsel %vm449_vm2, %v909_v11, %v911_v23  ;;  %v933_v1 = vadd.f32 %v911_v23, %v2742_v9  ;;  %v1093_v27 = vmul.f32 %v3024_v45, %v2827_v56  ;;  %v1094_v16 = vmul.f32 %v3024_v45, %v2695_v37 }
 0x1c4   : >> { %v932_v61 = vadd.f32 %v918_v58, %v2740_v29  ;;  %v1102_v11 = vmul.f32 %v3106_v6, %v3014_v55  ;;  %v1103_v29 = vmul.f32 %v1810_v13, %v3014_v55  ;;  %v3173_v35 = vadd.f32 %v3045_v36, %v1088_v44 }
 0x1c5   : >> { %v3162_v49 = vadd.f32 %v933_v1, %v3790_v52  ;;  %v1043_v9 = vpop.permute.xlu0 %1042  ;;  %v3176_v24 = vadd.f32 %v3064_v42, %v1089_v53  ;;  %v3179_v20 = vadd.f32 %v3075_v41, %v1090_v25  ;;  %v3183_v23 = vadd.f32 %v1100_v34, %v1091_v17 }
 0x1c6   : >> { %v3170_v33 = vadd.f32 %v932_v61, %v2947_v46  ;;  %v915_v38 = vpop.permute.xlu1 %914  ;;  %v3185_v55 = vadd.f32 %v1101_v19, %v1092_v47  ;;  %v3794_v46 = vld [vmem:[#allocation56_spill] sm:$0xff]  ;;  %v1174_v36 = vmul.f32 %v3036_v63, %v2801_v4  ;;  %v1175_v42 = vmul.f32 %v3036_v63, %v2583_v48 }
 0x1c7   : >> { %3791 = vst [vmem:[#allocation55_spill] sm:$0xff] %v3162_v49  ;;  %v919_v45 = vsel %vm449_vm2, %v913_v57, %v915_v38  ;;  %v935_v18 = vadd.f32 %v915_v38, %v3793_v50  ;;  %v1176_v41 = vmul.f32 %v3036_v63, %v2811_v43  ;;  %v3197_v34 = vadd.f32 %v1102_v11, %v1093_v27  ;;  %v3809_v50 = vld [vmem:[#allocation39_spill] sm:$0xff] }
 0x1c8   : >> { %3792 = vst [vmem:[#allocation34_spill] sm:$0xff] %v3170_v33  ;;  %v934_v58 = vadd.f32 %v919_v45, %v3794_v46  ;;  %v3199_v19 = vadd.f32 %v1103_v29, %v1094_v16  ;;  %v1177_v53 = vmul.f32 %v3036_v63, %v2619_v40  ;;  %v1178_v48 = vmul.f32 %v3036_v63, %v2819_v62 }
 0x1c9   : >> { %v3195_v57 = vadd.f32 %v935_v18, %v2951_v39  ;;  %v1047_v44 = vpop.permute.xlu0 %1046  ;;  %v1179_v43 = vmul.f32 %v3036_v63, %v2657_v51  ;;  %v1188_v39 = vmul.f32 %v3093_v22, %v3019_v12  ;;  %v1180_v47 = vmul.f32 %v3036_v63, %v2827_v56 }
 0x1ca   : >> { %v3204_v4 = vadd.f32 %v934_v58, %v2954_v32  ;;  %v1045_v25 = vpop.permute.xlu1 %1044  ;;  %v1189_v40 = vmul.f32 %v3106_v6, %v3019_v12  ;;  %v3218_v32 = vstv %s3795_s0  ;;  %v1181_v62 = vmul.f32 %v3036_v63, %v2695_v37  ;;  %v3799_v63 = vld [vmem:[#allocation50_spill] sm:$0xff]  ;;  %s3812_s0 = sld [smem:[#allocation33_spill]] }
 0x1cb   : >> { %3796 = vst [vmem:[#allocation35_spill] sm:$0xff] %v3195_v57  ;;  %v1058_v1 = vsel %vm449_vm2, %v1043_v9, %v1045_v25  ;;  %v1071_v17 = vadd.f32 %v1045_v25, %v1018_v5  ;;  %v1190_v51 = vmul.f32 %v1810_v13, %v3019_v12  ;;  %v3226_v5 = vadd.f32 %v3049_v54, %v1174_v36  ;;  %v3811_v36 = vld [vmem:[#allocation37_spill] sm:$0xff]  ;;  %v3817_v57 = vld [vmem:[#allocation43_spill] sm:$0xff] }
 0x1cc   : >> { %3797 = vst [vmem:[#allocation36_spill] sm:$0xff] %v3204_v4  ;;  %v1070_v61 = vadd.f32 %v1058_v1, %v3113_v3  ;;  %v3229_v56 = vadd.f32 %v3057_v0, %v1175_v42  ;;  %v3232_v6 = vadd.f32 %v3067_v28, %v1176_v41  ;;  %v3236_v12 = vadd.f32 %v3799_v63, %v1177_v53 }
 0x1cd   : >> { %v1079_v22 = vadd.f32 %v1071_v17, %v2960_v14  ;;  %v1051_v27 = vpop.permute.xlu0 %1050  ;;  %v3801_v14 = vld [vmem:[#allocation52_spill] sm:$0xff]  ;;  %v3241_v54 = vadd.f32 %v1188_v39, %v1179_v43  ;;  %v3246_v9 = vadd.f32 %v1189_v40, %v1180_v47  ;;  %v3253_v29 = vadd.f32 %v1190_v51, %v1181_v62 }
 0x1ce   : >> { %v1078_v3 = vadd.f32 %v1070_v61, %v2963_v15  ;;  %v1049_v37 = vpop.permute.xlu1 %1048  ;;  %v3239_v13 = vadd.f32 %v3801_v14, %v1178_v48  ;;  %v3249_v15 = vstv %s3798_s1  ;;  %v3256_v38 = vstv %s2108_s29  ;;  %s3828_s1 = sld [smem:[#allocation16_spill]] }
 0x1cf   : >> { %3803 = vst [vmem:[#allocation57_spill] sm:$0xff] %v3241_v54  ;;  %v1262_v52 = vadd.f32 %v3218_v32, %v1079_v22  ;;  %v1059_v0 = vsel %vm449_vm2, %v1047_v44, %v1049_v37  ;;  %v1073_v28 = vadd.f32 %v1049_v37, %v3121_v21  ;;  %3805 = vst [vmem:[#allocation56_spill] sm:$0xff] %v3246_v9  ;;  %v3259_v45 = vstv %s2114_s3 }
 0x1d0   : >> { %3802 = vst [vmem:[#allocation42_spill] sm:$0xff] %v3239_v13  ;;  %v1261_v16 = vadd.f32 %v3218_v32, %v1078_v3  ;;  %v1072_v11 = vadd.f32 %v1059_v0, %v3119_v26  ;;  %3807 = vst [vmem:[#allocation50_spill] sm:$0xff] %v3253_v29  ;;  %v3263_v46 = vstv %s3800_s7  ;;  %v3267_v26 = vstv %s3804_s19  ;;  %v3818_v29 = vld [vmem:[#allocation41_spill] sm:$0xff]  ;;  %s3831_s7 = smul.u32 192, %s1897_s28  ;;  %s332_s28 = sadd.s32 1, %s1897_s28  }
 0x1d1   : >> { %v1081_v21 = vadd.f32 %v1073_v28, %v3809_v50  ;;  %v1055_v18 = vpop.permute.xlu0 %1054  ;;  %v1270_v58 = vmax.f32 %v1262_v52, 0.0  ;;  %v3270_v44 = vstv %s2110_s30  ;;  %v3274_v48 = vstv %s2116_s4  ;;  %v3815_v28 = vld [vmem:[#allocation40_spill] sm:$0xff]  ;;  %p329_p2 = scmp.ge.s32.totalorder %s332_s28, 2  }
 0x1d2   : >> { %v1080_v42 = vadd.f32 %v1072_v11, %v3811_v36  ;;  %v1053_v41 = vpop.permute.xlu1 %1052  ;;  %v1269_v53 = vmax.f32 %v1261_v16, 0.0  ;;  %v3277_v43 = vstv %s3806_s6  ;;  %v3281_v1 = vstv %s3808_s17 }
 0x1d3   : >> { %v1264_v25 = vadd.f32 %v3218_v32, %v1081_v21  ;;  %v3284_v17 = vstv %s2120_s18  ;;  %v3287_v47 = vstv %s3810_s2  ;;  %v1060_v61 = vsel %vm449_vm2, %v1051_v27, %v1053_v41  ;;  %v3816_v21 = vld [vmem:[#allocation38_spill] sm:$0xff] }
 0x1d4   : >> { %v1263_v39 = vadd.f32 %v3218_v32, %v1080_v42  ;;  %v1075_v62 = vadd.f32 %v1053_v41, %v3134_v31  ;;  %v3292_v22 = vstv %s2122_s10  ;;  %v3295_v3 = vmul.f32 %v3249_v15, %v1270_v58  ;;  %s3546_s19 = scalar_lea.vmem %s3828_s1, %s3831_s7 }
 0x1d5   : >> { %v1272_v40 = vmax.f32 %v1264_v25, 0.0  ;;  %v1130_v51 = vpop.permute.xlu0 %1129  ;;  %3813 = vst [vmem:[#allocation52_spill] sm:$0xff] %v3292_v22  ;;  %v1074_v37 = vadd.f32 %v1060_v61, %v3132_v2  ;;  %v3299_v14 = vstv %s2118_s5  ;;  %v3302_v52 = vstv %s3812_s0 }
 0x1d6   : >> { %v1057_v63 = vpop.permute.xlu1 %1056  ;;  %3814 = vst [vmem:[#allocation39_spill] sm:$0xff] %v3302_v52  ;;  %v3305_v0 = vmul.f32 %v3249_v15, %v1269_v53  ;;  %v3308_v27 = vmul.f32 %v3256_v38, %v1270_v58  ;;  %v3311_v31 = vmul.f32 %v3259_v45, %v1270_v58  ;;  %v1083_v16 = vadd.f32 %v1075_v62, %v3815_v28 }
 0x1d7   : >> { %v3315_v11 = vmul.f32 %v3256_v38, %v1269_v53  ;;  %v3318_v2 = vmul.f32 %v3259_v45, %v1269_v53  ;;  %v1271_v50 = vmax.f32 %v1263_v39, 0.0  ;;  %v1082_v36 = vadd.f32 %v1074_v37, %v3816_v21 }
 0x1d8   : >> { %v3322_v42 = vmul.f32 %v3249_v15, %v1272_v40  ;;  %v1266_v41 = vadd.f32 %v3218_v32, %v1083_v16  ;;  %v1061_v25 = vsel %vm449_vm2, %v1055_v18, %v1057_v63  ;;  %v1077_v58 = vadd.f32 %v1057_v63, %v3154_v30 }
 0x1d9   : >> { %v1134_v61 = vpop.permute.xlu0 %1133  ;;  %v3328_v62 = vmul.f32 %v3256_v38, %v1272_v40  ;;  %v3331_v28 = vmul.f32 %v3259_v45, %v1272_v40  ;;  %v1265_v53 = vadd.f32 %v3218_v32, %v1082_v36  ;;  %v1076_v39 = vadd.f32 %v1061_v25, %v3136_v8 }
 0x1da   : >> { %v1132_v37 = vpop.permute.xlu1 %1131  ;;  %v1274_v21 = vmax.f32 %v1266_v41, 0.0  ;;  %v1085_v4 = vadd.f32 %v1077_v58, %v3817_v57  ;;  %v3339_v30 = vmul.f32 %v3249_v15, %v1271_v50  ;;  %v3344_v36 = vmul.f32 %v3256_v38, %v1271_v50 }
 0x1db   : >> { %v1145_v16 = vsel %vm449_vm2, %v1130_v51, %v1132_v37  ;;  %v1158_v18 = vadd.f32 %v1132_v37, %v3173_v35  ;;  %v1273_v63 = vmax.f32 %v1265_v53, 0.0  ;;  %v1084_v9 = vadd.f32 %v1076_v39, %v3818_v29  ;;  %v3819_v53 = vld [vmem:[#allocation44_spill] sm:$0xff]  ;;  %v3820_v37 = vld [vmem:[#allocation46_spill] sm:$0xff] }
 0x1dc   : >> { %v1157_v40 = vadd.f32 %v1145_v16, %v3157_v59  ;;  %v3347_v8 = vmul.f32 %v3259_v45, %v1271_v50  ;;  %v3350_v57 = vmul.f32 %v3249_v15, %v1274_v21  ;;  %v1268_v51 = vadd.f32 %v3218_v32, %v1085_v4 }
 0x1dd   : >> { %v1138_v35 = vpop.permute.xlu0 %1137  ;;  %v3354_v41 = vmul.f32 %v3249_v15, %v1273_v63  ;;  %v3357_v25 = vmul.f32 %v3256_v38, %v1274_v21  ;;  %v3360_v59 = vmul.f32 %v3259_v45, %v1274_v21  ;;  %v1267_v29 = vadd.f32 %v3218_v32, %v1084_v9 }
 0x1de   : >> { %v1136_v58 = vpop.permute.xlu1 %1135  ;;  %v1276_v50 = vmax.f32 %v1268_v51, 0.0  ;;  %v1165_v39 = vadd.f32 %v1157_v40, %v3819_v53  ;;  %v1166_v16 = vadd.f32 %v1158_v18, %v3820_v37  ;;  %v3367_v49 = vmul.f32 %v3256_v38, %v1273_v63  ;;  %v3822_v37 = vld [vmem:[#allocation47_spill] sm:$0xff] }
 0x1df   : >> { %v1146_v4 = vsel %vm449_vm2, %v1134_v61, %v1136_v58  ;;  %v1275_v33 = vmax.f32 %v1267_v29, 0.0  ;;  %v1160_v13 = vadd.f32 %v1136_v58, %v3179_v20  ;;  %v3372_v21 = vmul.f32 %v3259_v45, %v1273_v63  ;;  %v3821_v58 = vld [vmem:[#allocation45_spill] sm:$0xff] }
 0x1e0   : >> { %v1159_v54 = vadd.f32 %v1146_v4, %v3176_v24  ;;  %v3375_v32 = vmul.f32 %v3249_v15, %v1276_v50  ;;  %v3378_v9 = vmul.f32 %v3256_v38, %v1276_v50  ;;  %v1278_v18 = vadd.f32 %v3263_v46, %v1165_v39 }
 0x1e1   : >> { %v1142_v61 = vpop.permute.xlu0 %1141  ;;  %v3382_v40 = vmul.f32 %v3249_v15, %v1275_v33  ;;  %v3385_v51 = vmul.f32 %v3256_v38, %v1275_v33  ;;  %v3388_v24 = vmul.f32 %v3259_v45, %v1276_v50  ;;  %v1279_v20 = vadd.f32 %v3263_v46, %v1166_v16 }
 0x1e2   : >> { %v1140_v63 = vpop.permute.xlu1 %1139  ;;  %v1286_v29 = vmax.f32 %v1278_v18, 0.0  ;;  %v1167_v53 = vadd.f32 %v1159_v54, %v3821_v58  ;;  %v1168_v4 = vadd.f32 %v1160_v13, %v3822_v37  ;;  %v3395_v52 = vmul.f32 %v3259_v45, %v1275_v33 }
 0x1e3   : >> { %v1147_v39 = vsel %vm449_vm2, %v1138_v35, %v1140_v63  ;;  %v1287_v15 = vmax.f32 %v1279_v20, 0.0  ;;  %v1162_v22 = vadd.f32 %v1140_v63, %v3185_v55 }
 0x1e4   : >> { %v1161_v38 = vadd.f32 %v1147_v39, %v3183_v23  ;;  %v1321_v50 = vmul.f32 %v3267_v26, %v1286_v29  ;;  %v1393_v16 = vmul.f32 %v3270_v44, %v1286_v29  ;;  %v1463_v18 = vmul.f32 %v3274_v48, %v1286_v29 }
 0x1e5   : >> { %v1280_v54 = vadd.f32 %v3263_v46, %v1167_v53  ;;  %v1322_v13 = vmul.f32 %v3267_v26, %v1287_v15  ;;  %v1394_v35 = vmul.f32 %v3270_v44, %v1287_v15  ;;  %v1464_v33 = vmul.f32 %v3274_v48, %v1287_v15  ;;  %v1217_v58 = vpop.permute.xlu0 %1216 }
 0x1e6   : >> { %v1281_v45 = vadd.f32 %v3263_v46, %v1168_v4  ;;  %v1144_v20 = vpop.permute.xlu1 %1143  ;;  %v3408_v23 = vadd.f32 %v1321_v50, %v3305_v0  ;;  %v3411_v55 = vadd.f32 %v1393_v16, %v3315_v11  ;;  %v3414_v63 = vadd.f32 %v1463_v18, %v3318_v2  ;;  %v3823_v2 = vld [vmem:[#allocation49_spill] sm:$0xff] }
 0x1e7   : >> { %v1288_v29 = vmax.f32 %v1280_v54, 0.0  ;;  %v3417_v53 = vadd.f32 %v1322_v13, %v3295_v3  ;;  %v3420_v37 = vadd.f32 %v1394_v35, %v3308_v27  ;;  %v3423_v4 = vadd.f32 %v1464_v33, %v3311_v31  ;;  %v3824_v27 = vld [vmem:[#allocation48_spill] sm:$0xff] }
 0x1e8   : >> { %v1289_v39 = vmax.f32 %v1281_v45, 0.0  ;;  %v1169_v50 = vadd.f32 %v1161_v38, %v3823_v2  ;;  %v1170_v54 = vadd.f32 %v1162_v22, %v3824_v27 }
 0x1e9   : >> { %v1323_v0 = vmul.f32 %v3267_v26, %v1288_v29  ;;  %v1395_v11 = vmul.f32 %v3270_v44, %v1288_v29  ;;  %v1465_v15 = vmul.f32 %v3274_v48, %v1288_v29 }
 0x1ea   : >> { %v1324_v16 = vmul.f32 %v3267_v26, %v1289_v39  ;;  %v1396_v3 = vmul.f32 %v3270_v44, %v1289_v39  ;;  %v1466_v18 = vmul.f32 %v3274_v48, %v1289_v39  ;;  %v1219_v13 = vpop.permute.xlu1 %1218  ;;  %v1282_v38 = vadd.f32 %v3263_v46, %v1169_v50 }
 0x1eb   : >> { %v3434_v31 = vadd.f32 %v1323_v0, %v3339_v30  ;;  %v3437_v35 = vadd.f32 %v1395_v11, %v3344_v36  ;;  %v3440_v33 = vadd.f32 %v1465_v15, %v3347_v8  ;;  %v1283_v30 = vadd.f32 %v3263_v46, %v1170_v54  ;;  %v1221_v8 = vpop.permute.xlu0 %1220 }
 0x1ec   : >> { %v3444_v45 = vadd.f32 %v1324_v16, %v3322_v42  ;;  %v3447_v29 = vadd.f32 %v1396_v3, %v3328_v62  ;;  %v3450_v22 = vadd.f32 %v1466_v18, %v3331_v28  ;;  %v1290_v39 = vmax.f32 %v1282_v38, 0.0 }
 0x1ed   : >> { %v1148_v36 = vsel %vm449_vm2, %v1142_v61, %v1144_v20  ;;  %v1164_v0 = vadd.f32 %v1144_v20, %v3199_v19  ;;  %v1232_v11 = vsel %vm449_vm2, %v1217_v58, %v1219_v13  ;;  %v1291_v15 = vmax.f32 %v1283_v30, 0.0  ;;  %v3825_v61 = vld [vmem:[#allocation51_spill] sm:$0xff] }
 0x1ee   : >> { %v1163_v42 = vadd.f32 %v1148_v36, %v3197_v34  ;;  %v1244_v2 = vadd.f32 %v1232_v11, %v3226_v5  ;;  %v1245_v62 = vadd.f32 %v1219_v13, %v3229_v56  ;;  %v1223_v50 = vpop.permute.xlu1 %1222  ;;  %v1325_v28 = vmul.f32 %v3267_v26, %v1290_v39  ;;  %v3826_v34 = vld [vmem:[#allocation53_spill] sm:$0xff] }
 0x1ef   : >> { %v1397_v16 = vmul.f32 %v3270_v44, %v1290_v39  ;;  %v1467_v3 = vmul.f32 %v3274_v48, %v1290_v39  ;;  %v1172_v18 = vadd.f32 %v1164_v0, %v3825_v61  ;;  %v1326_v19 = vmul.f32 %v3267_v26, %v1291_v15 }
 0x1f0   : >> { %v1398_v20 = vmul.f32 %v3270_v44, %v1291_v15  ;;  %v1468_v58 = vmul.f32 %v3274_v48, %v1291_v15  ;;  %v1171_v27 = vadd.f32 %v1163_v42, %v3826_v34  ;;  %v3468_v5 = vadd.f32 %v1325_v28, %v3354_v41  ;;  %v1225_v15 = vpop.permute.xlu0 %1224 }
 0x1f1   : >> { %v3471_v56 = vadd.f32 %v1397_v16, %v3367_v49  ;;  %v3474_v54 = vadd.f32 %v1467_v3, %v3372_v21  ;;  %v1285_v13 = vadd.f32 %v3263_v46, %v1172_v18  ;;  %v3478_v38 = vadd.f32 %v1326_v19, %v3350_v57  ;;  %v3827_v21 = vld [vmem:[#allocation54_spill] sm:$0xff] }
 0x1f2   : >> { %v3481_v30 = vadd.f32 %v1398_v20, %v3357_v25  ;;  %v3484_v39 = vadd.f32 %v1468_v58, %v3360_v59  ;;  %v1284_v41 = vadd.f32 %v3263_v46, %v1171_v27  ;;  %v3487_v36 = vpop.permute.xlu1 %1226  ;;  %v1252_v0 = vadd.f32 %v1244_v2, %v3111_v7 }
 0x1f3   : >> { %v1293_v49 = vmax.f32 %v1285_v13, 0.0  ;;  %v1253_v11 = vadd.f32 %v1245_v62, %v3827_v21  ;;  %v1233_v42 = vsel %vm449_vm2, %v1221_v8, %v1223_v50  ;;  %v1247_v25 = vadd.f32 %v1223_v50, %v3236_v12 }
 0x1f4   : >> { %v1292_v57 = vmax.f32 %v1284_v41, 0.0  ;;  %v1246_v28 = vadd.f32 %v1233_v42, %v3232_v6  ;;  %v3496_v59 = vsel %vm449_vm2, %v1225_v15, %v3487_v36  ;;  %v1295_v2 = vadd.f32 %v3277_v43, %v1252_v0  ;;  %v3829_v15 = vld [vmem:[#allocation52_spill] sm:$0xff]  ;;  %v3830_v42 = vld [vmem:[#allocation39_spill] sm:$0xff] }
 0x1f5   : >> { %v1328_v46 = vmul.f32 %v3267_v26, %v1293_v49  ;;  %v1400_v16 = vmul.f32 %v3270_v44, %v1293_v49  ;;  %v1470_v7 = vmul.f32 %v3274_v48, %v1293_v49  ;;  %v1296_v12 = vadd.f32 %v3277_v43, %v1253_v11 }
 0x1f6   : >> { %v1327_v62 = vmul.f32 %v3267_v26, %v1292_v57  ;;  %v1399_v8 = vmul.f32 %v3270_v44, %v1292_v57  ;;  %v1469_v6 = vmul.f32 %v3274_v48, %v1292_v57  ;;  %v1303_v18 = vmax.f32 %v1295_v2, 0.0 }
 0x1f7   : >> { %v3507_v50 = vadd.f32 %v1328_v46, %v3375_v32  ;;  %v3510_v3 = vadd.f32 %v1400_v16, %v3378_v9  ;;  %v3513_v61 = vadd.f32 %v1470_v7, %v3388_v24  ;;  %v1304_v48 = vmax.f32 %v1296_v12, 0.0 }
 0x1f8   : >> { %v3516_v19 = vadd.f32 %v1327_v62, %v3382_v40  ;;  %v3519_v26 = vadd.f32 %v1399_v8, %v3385_v51  ;;  %v3522_v44 = vadd.f32 %v1469_v6, %v3395_v52  ;;  %v1338_v32 = vmul.f32 %v3281_v1, %v1303_v18 }
 0x1f9   : >> { %v1410_v9 = vmul.f32 %v3287_v47, %v1303_v18  ;;  %v1480_v20 = vmul.f32 %v3299_v14, %v1303_v18  ;;  %v1254_v24 = vadd.f32 %v1246_v28, %v3139_v10  ;;  %v1339_v58 = vmul.f32 %v3281_v1, %v1304_v48 }
 0x1fa   : >> { %v1411_v40 = vmul.f32 %v3287_v47, %v1304_v48  ;;  %v1481_v51 = vmul.f32 %v3299_v14, %v1304_v48  ;;  %v1255_v52 = vadd.f32 %v1247_v25, %v3130_v60  ;;  %v1346_v34 = vadd.f32 %v1338_v32, %v3408_v23 }
 0x1fb   : >> { %v1418_v27 = vadd.f32 %v1410_v9, %v3411_v55  ;;  %v1488_v13 = vadd.f32 %v1480_v20, %v3414_v63  ;;  %v1297_v41 = vadd.f32 %v3277_v43, %v1254_v24  ;;  %v1347_v10 = vadd.f32 %v1339_v58, %v3417_v53  ;;  %v3832_v9 = vld [vmem:[#allocation42_spill] sm:$0xff] }
 0x1fc   : >> { %v1419_v49 = vadd.f32 %v1411_v40, %v3420_v37  ;;  %v1489_v0 = vadd.f32 %v1481_v51, %v3423_v4  ;;  %v1298_v21 = vadd.f32 %v3277_v43, %v1255_v52  ;;  %v1355_v11 = vadd.f32 %v3284_v17, %v1346_v34 }
 0x1fd   : >> { %v1427_v60 = vadd.f32 %v3829_v15, %v1418_v27  ;;  %v1497_v23 = vadd.f32 %v3830_v42, %v1488_v13  ;;  %v1305_v57 = vmax.f32 %v1297_v41, 0.0  ;;  %v1356_v55 = vadd.f32 %v3284_v17, %v1347_v10  ;;  %v3834_v27 = vld [vmem:[#allocation34_spill] sm:$0xff]  ;;  %v3835_v41 = vld [vmem:[#allocation55_spill] sm:$0xff]  ;;  %v1231_v10 = vpop.permute.xlu1 %1230 }
 0x1fe   : >> { %v1428_v63 = vadd.f32 %v3829_v15, %v1419_v49  ;;  %v1498_v53 = vadd.f32 %v3830_v42, %v1489_v0  ;;  %v1306_v37 = vmax.f32 %v1298_v21, 0.0  ;;  %v1363_v4 = vmax.f32 %v1355_v11, 0.0 }
 0x1ff   : >> { %v1435_v28 = vmax.f32 %v1427_v60, 0.0  ;;  %v1505_v25 = vmax.f32 %v1497_v23, 0.0  ;;  %v1340_v46 = vmul.f32 %v3281_v1, %v1305_v57  ;;  %v1364_v16 = vmax.f32 %v1356_v55, 0.0 }
 0x200   : >> { %v1436_v7 = vmax.f32 %v1428_v63, 0.0  ;;  %v1506_v2 = vmax.f32 %v1498_v53, 0.0  ;;  %v1341_v62 = vmul.f32 %v3281_v1, %v1306_v37  ;;  %1373 = vst [vmem:[%s3546_s19] sm:$0xff] %v1363_v4  ;;  %v1412_v6 = vmul.f32 %v3287_v47, %v1305_v57  ;;  %v3836_v4 = vld [vmem:[#allocation56_spill] sm:$0xff] }
 0x201   : >> { %1723 = vst [vmem:[%s3546_s19 + $0x40] sm:$0xff] %v1435_v28  ;;  %1732 = vst [vmem:[%s3546_s19 + $0x80] sm:$0xff] %v1505_v25  ;;  %v1348_v8 = vadd.f32 %v1340_v46, %v3434_v31  ;;  %v1413_v12 = vmul.f32 %v3287_v47, %v1306_v37  ;;  %v1482_v18 = vmul.f32 %v3299_v14, %v1305_v57  ;;  %v3833_v31 = vld [vmem:[#allocation57_spill] sm:$0xff]  ;;  %v3837_v25 = vld [vmem:[#allocation50_spill] sm:$0xff] }
 0x202   : >> { %1375 = vst.msk [vmem:[%s3546_s19 + $0x8] sm:$0xff] %vm1374_vm3, %v1364_v16  ;;  %1724 = vst.msk [vmem:[%s3546_s19 + $0x48] sm:$0xff] %vm1374_vm3, %v1436_v7  ;;  %v1349_v48 = vadd.f32 %v1341_v62, %v3444_v45  ;;  %v1483_v32 = vmul.f32 %v3299_v14, %v1306_v37  ;;  %v1248_v20 = vadd.f32 %v3496_v59, %v3832_v9 }
 0x203   : >> { %1733 = vst.msk [vmem:[%s3546_s19 + $0x88] sm:$0xff] %vm1374_vm3, %v1506_v2  ;;  %v1249_v24 = vadd.f32 %v3487_v36, %v3833_v31  ;;  %v1357_v58 = vadd.f32 %v3284_v17, %v1348_v8  ;;  %v1420_v40 = vadd.f32 %v1412_v6, %v3437_v35  ;;  %v1421_v51 = vadd.f32 %v1413_v12, %v3447_v29  ;;  %v3838_v12 = vld [vmem:[#allocation36_spill] sm:$0xff] }
 0x204   : >> { %v1490_v52 = vadd.f32 %v1482_v18, %v3440_v33  ;;  %v1358_v34 = vadd.f32 %v3284_v17, %v1349_v48  ;;  %v1491_v45 = vadd.f32 %v1483_v32, %v3450_v22  ;;  %v1256_v13 = vadd.f32 %v1248_v20, %v3834_v27  ;;  %v1229_v22 = vpop.permute.xlu0 %1228  ;;  %v3839_v48 = vld [vmem:[#allocation35_spill] sm:$0xff] }
 0x205   : >> { %v1257_v59 = vadd.f32 %v1249_v24, %v3835_v41  ;;  %v1365_v36 = vmax.f32 %v1357_v58, 0.0  ;;  %v1429_v49 = vadd.f32 %v3829_v15, %v1420_v40  ;;  %v1430_v35 = vadd.f32 %v3829_v15, %v1421_v51 }
 0x206   : >> { %v1499_v29 = vadd.f32 %v3830_v42, %v1490_v52  ;;  %v1366_v0 = vmax.f32 %v1358_v34, 0.0  ;;  %v1500_v33 = vadd.f32 %v3830_v42, %v1491_v45  ;;  %v1299_v21 = vadd.f32 %v3277_v43, %v1256_v13 }
 0x207   : >> { %v1300_v11 = vadd.f32 %v3277_v43, %v1257_v59  ;;  %1376 = vst [vmem:[%s3546_s19 + $0x10] sm:$0xff] %v1365_v36  ;;  %v1437_v60 = vmax.f32 %v1429_v49, 0.0  ;;  %v1438_v23 = vmax.f32 %v1430_v35, 0.0  ;;  %v1235_v55 = vsel %vm449_vm2, %v1229_v22, %v1231_v10 }
 0x208   : >> { %v1507_v57 = vmax.f32 %v1499_v29, 0.0  ;;  %1377 = vst.msk [vmem:[%s3546_s19 + $0x18] sm:$0xff] %vm1374_vm3, %v1366_v0  ;;  %v1508_v63 = vmax.f32 %v1500_v33, 0.0  ;;  %v1307_v53 = vmax.f32 %v1299_v21, 0.0  ;;  %v1250_v28 = vadd.f32 %v1235_v55, %v3836_v4 }
 0x209   : >> { %v1308_v37 = vmax.f32 %v1300_v11, 0.0  ;;  %1725 = vst [vmem:[%s3546_s19 + $0x50] sm:$0xff] %v1437_v60  ;;  %1726 = vst.msk [vmem:[%s3546_s19 + $0x58] sm:$0xff] %vm1374_vm3, %v1438_v23  ;;  %v1251_v46 = vadd.f32 %v1231_v10, %v3837_v25 }
 0x20a   : >> { %1734 = vst [vmem:[%s3546_s19 + $0x90] sm:$0xff] %v1507_v57  ;;  %1735 = vst.msk [vmem:[%s3546_s19 + $0x98] sm:$0xff] %vm1374_vm3, %v1508_v63  ;;  %v1342_v16 = vmul.f32 %v3281_v1, %v1307_v53  ;;  %v1414_v2 = vmul.f32 %v3287_v47, %v1307_v53  ;;  %v1484_v8 = vmul.f32 %v3299_v14, %v1307_v53 }
 0x20b   : >> { %v1343_v7 = vmul.f32 %v3281_v1, %v1308_v37  ;;  %v1415_v62 = vmul.f32 %v3287_v47, %v1308_v37  ;;  %v1485_v6 = vmul.f32 %v3299_v14, %v1308_v37  ;;  %v1258_v18 = vadd.f32 %v1250_v28, %v3838_v12 }
 0x20c   : >> { %v1259_v32 = vadd.f32 %v1251_v46, %v3839_v48  ;;  %v1350_v9 = vadd.f32 %v1342_v16, %v3468_v5  ;;  %v1422_v31 = vadd.f32 %v1414_v2, %v3471_v56  ;;  %v1492_v58 = vadd.f32 %v1484_v8, %v3474_v54 }
 0x20d   : >> { %v1351_v20 = vadd.f32 %v1343_v7, %v3478_v38  ;;  %v1423_v24 = vadd.f32 %v1415_v62, %v3481_v30  ;;  %v1493_v40 = vadd.f32 %v1485_v6, %v3484_v39  ;;  %v1301_v51 = vadd.f32 %v3277_v43, %v1258_v18 }
 0x20e   : >> { %v1302_v52 = vadd.f32 %v3277_v43, %v1259_v32  ;;  %v1359_v34 = vadd.f32 %v3284_v17, %v1350_v9  ;;  %v1431_v5 = vadd.f32 %v3829_v15, %v1422_v31  ;;  %v1501_v54 = vadd.f32 %v3830_v42, %v1492_v58 }
 0x20f   : >> { %v1360_v45 = vadd.f32 %v3284_v17, %v1351_v20  ;;  %v1432_v56 = vadd.f32 %v3829_v15, %v1423_v24  ;;  %v1502_v38 = vadd.f32 %v3830_v42, %v1493_v40  ;;  %v1309_v30 = vmax.f32 %v1301_v51, 0.0 }
 0x210   : >> { %v1310_v39 = vmax.f32 %v1302_v52, 0.0  ;;  %v1367_v27 = vmax.f32 %v1359_v34, 0.0  ;;  %v1439_v13 = vmax.f32 %v1431_v5, 0.0  ;;  %v1509_v59 = vmax.f32 %v1501_v54, 0.0 }
 0x211   : >> { %v1368_v43 = vmax.f32 %v1360_v45, 0.0  ;;  %v1440_v41 = vmax.f32 %v1432_v56, 0.0  ;;  %v1510_v10 = vmax.f32 %v1502_v38, 0.0  ;;  %v1344_v36 = vmul.f32 %v3281_v1, %v1309_v30 }
 0x212   : >> { %v1345_v49 = vmul.f32 %v3281_v1, %v1310_v39  ;;  %1378 = vst [vmem:[%s3546_s19 + $0x20] sm:$0xff] %v1367_v27  ;;  %1727 = vst [vmem:[%s3546_s19 + $0x60] sm:$0xff] %v1439_v13  ;;  %v1416_v35 = vmul.f32 %v3287_v47, %v1309_v30  ;;  %v1417_v29 = vmul.f32 %v3287_v47, %v1310_v39 }
 0x213   : >> { %1379 = vst.msk [vmem:[%s3546_s19 + $0x28] sm:$0xff] %vm1374_vm3, %v1368_v43  ;;  %1728 = vst.msk [vmem:[%s3546_s19 + $0x68] sm:$0xff] %vm1374_vm3, %v1440_v41  ;;  %v1486_v0 = vmul.f32 %v3299_v14, %v1309_v30  ;;  %v1487_v33 = vmul.f32 %v3299_v14, %v1310_v39  ;;  %v1352_v22 = vadd.f32 %v1344_v36, %v3516_v19 }
 0x214   : >> { %1736 = vst [vmem:[%s3546_s19 + $0xa0] sm:$0xff] %v1509_v59  ;;  %1737 = vst.msk [vmem:[%s3546_s19 + $0xa8] sm:$0xff] %vm1374_vm3, %v1510_v10  ;;  %v1353_v1 = vadd.f32 %v1345_v49, %v3507_v50  ;;  %v1424_v21 = vadd.f32 %v1416_v35, %v3519_v26  ;;  %v1425_v11 = vadd.f32 %v1417_v29, %v3510_v3 }
 0x215   : >> { %v1494_v60 = vadd.f32 %v1486_v0, %v3522_v44  ;;  %v1495_v47 = vadd.f32 %v1487_v33, %v3513_v61  ;;  %v1361_v14 = vadd.f32 %v3284_v17, %v1352_v22 }
 0x216   : >> { %v1362_v19 = vadd.f32 %v3284_v17, %v1353_v1  ;;  %v1433_v50 = vadd.f32 %v3829_v15, %v1424_v21  ;;  %v1434_v26 = vadd.f32 %v3829_v15, %v1425_v11  ;;  %331 = sbr.rel (!%p329_p2) target bundleno = 117 (0x75), region = 100 }
 0x217   : >> { %v1503_v3 = vadd.f32 %v3830_v42, %v1494_v60  ;;  %v1504_v44 = vadd.f32 %v3830_v42, %v1495_v47  ;;  %v1369_v23 = vmax.f32 %v1361_v14, 0.0 }
 0x218   : >> { %v1370_v57 = vmax.f32 %v1362_v19, 0.0  ;;  %v1441_v61 = vmax.f32 %v1433_v50, 0.0  ;;  %v1442_v55 = vmax.f32 %v1434_v26, 0.0 }
 0x219   : >> { %v1511_v63 = vmax.f32 %v1503_v3, 0.0  ;;  %v1512_v53 = vmax.f32 %v1504_v44, 0.0  ;;  %1380 = vst [vmem:[%s3546_s19 + $0x30] sm:$0x1] %v1369_v23 }
 0x21a   : >> { %1382 = vst.msk [vmem:[%s3546_s19 + $0x38] sm:$0x1] %vm1381_vm4, %v1370_v57  ;;  %1729 = vst [vmem:[%s3546_s19 + $0x70] sm:$0x1] %v1441_v61 }
 0x21b   : >> { %1730 = vst.msk [vmem:[%s3546_s19 + $0x78] sm:$0x1] %vm1381_vm4, %v1442_v55  ;;  %1738 = vst [vmem:[%s3546_s19 + $0xb0] sm:$0x1] %v1511_v63 }
 0x21c   : >> { %1739 = vst.msk [vmem:[%s3546_s19 + $0xb8] sm:$0x1] %vm1381_vm4, %v1512_v53 }
 0x21d PF: > { %s3840_s6 = sld [smem:[#allocation12_spill]] }
 0x223   : > { %s18_s18 = sadd.s32 1, %s3840_s6  }
 0x224   : > { %p15_p5 = scmp.ge.s32.totalorder %s18_s18, 6  }
 0x226   :  { %17 = sbr.rel (!%p15_p5) target bundleno = 10 (0xa), region = 111 }
 0x22d   :  { %1547 = vsyncpa [#allocation3], 1 }
 0x22e   :  { %1549 = vsyncpa [#allocation3 + $0x1], 1 }
 0x22f   :  { %1550 = vsyncpa [#allocation5], 1 }
 0x230   :  { %1551 = vsyncpa [#allocation8], 1 }

</bundles_post_ra>
